<compile_context>
chip_gen: v7x
topology: tpu7x:2x2x1
jax: 0.10.0
libtpu: 0.0.40
codegen_flags: <defaults>
</compile_context>

<pallas_src>
import math

import jax
import jax.numpy as jnp
from jax.experimental import pallas as pl
from jax.experimental.pallas import tpu as pltpu

RANK = 4
OUT_DIM = 128
FUSED_N = RANK * OUT_DIM      # 512 — rank-stacked fusion width
MOD_DIM = 128                 # dna / aa / tab encoded feature width
TOOL_DIM = 4                  # raw tool features
TOOL_PAD = 8                  # tool K padded 4 -> 8 (padded cols are zero)


def _round_up(n, m):
    return ((n + m - 1) // m) * m


def modvar_kernel(
    dna_ref, aa_ref, tab_ref, tool_ref,
    seq_w_ref, seq_b_ref,
    aa_w_ref, aa_b_ref,
    tab_w_ref, tab_b_ref,
    tool_w_ref, tool_b_ref,
    fb_ref,
    w1_ref, b1_ref,
    w2_ref, b2_ref,
    w3_ref, b3_ref,
    w4_ref, b4_ref,
    w5_ref, b5_ref,
    out_ref,
):
    f32 = jnp.float32
    bf16 = jnp.bfloat16

    dna = dna_ref[...].astype(bf16)          # [TB, 128]
    aa = aa_ref[...].astype(bf16)            # [TB, 128]
    tab = tab_ref[...].astype(bf16)          # [TB, 128]
    tool = tool_ref[...].astype(bf16)        # [TB, 8] (cols 4..7 zero)

    # Rank-stacked LMF factors: each dot gives [TB, RANK*128]; rank r lives in
    # lane block [r*128:(r+1)*128].  fusion_weights are pre-folded into tool_*.
    fseq = jnp.dot(dna, seq_w_ref[...], preferred_element_type=f32) + seq_b_ref[...]
    faa = jnp.dot(aa, aa_w_ref[...], preferred_element_type=f32) + aa_b_ref[...]
    ftab = jnp.dot(tab, tab_w_ref[...], preferred_element_type=f32) + tab_b_ref[...]
    ftool = jnp.dot(tool, tool_w_ref[...], preferred_element_type=f32) + tool_b_ref[...]

    prod = fseq * faa * ftab * ftool                                    # [TB, 512]
    output = (prod[:, 0:128] + prod[:, 128:256]
              + prod[:, 256:384] + prod[:, 384:512]) + fb_ref[...]     # [TB, 128]

    # MLP head: fc1 (relu then sigmoid), fc2..fc4 relu, fc5 sigmoid.
    h = jnp.dot(output.astype(bf16), w1_ref[...], preferred_element_type=f32) + b1_ref[...]
    h = jax.nn.sigmoid(jnp.maximum(h, 0.0))
    h = jnp.maximum(
        jnp.dot(h.astype(bf16), w2_ref[...], preferred_element_type=f32) + b2_ref[...], 0.0)
    h = jnp.maximum(
        jnp.dot(h.astype(bf16), w3_ref[...], preferred_element_type=f32) + b3_ref[...], 0.0)
    h = jnp.maximum(
        jnp.dot(h.astype(bf16), w4_ref[...], preferred_element_type=f32) + b4_ref[...], 0.0)
    res = jnp.dot(h.astype(bf16), w5_ref[...], preferred_element_type=f32) + b5_ref[...]
    out_ref[...] = jax.nn.sigmoid(res)       # lane 0 is the real output


# ---------------------------------------------------------------------------
# Parameter construction (raw layout, mirrors the PyTorch module) + packing
# into the kernel's optimized layout.
# ---------------------------------------------------------------------------

def xavier_normal(key, shape):
    fan_in, fan_out = shape[-2], shape[-1]
    std = math.sqrt(2.0 / (fan_in + fan_out))
    return std * jax.random.normal(key, shape, jnp.float32)


def linear_init(key, in_dim, out_dim):
    kw, kb = jax.random.split(key)
    bound = 1.0 / math.sqrt(in_dim)
    w = jax.random.uniform(kw, (in_dim, out_dim), jnp.float32, -bound, bound)
    b = jax.random.uniform(kb, (1, out_dim), jnp.float32, -bound, bound)
    return w, b


def make_params(key):
    keys = jax.random.split(key, 16)
    p = {}
    seq_f = xavier_normal(keys[0], (RANK, MOD_DIM + 1, OUT_DIM))
    aa_f = xavier_normal(keys[1], (RANK, MOD_DIM + 1, OUT_DIM))
    tab_f = xavier_normal(keys[2], (RANK, MOD_DIM + 1, OUT_DIM))
    tool_f = xavier_normal(keys[3], (RANK, TOOL_DIM + 1, OUT_DIM))
    # ones column is concatenated in front -> row 0 of each factor is the bias.
    p["seq_w"], p["seq_b"] = seq_f[:, 1:, :], seq_f[:, 0:1, :]
    p["aa_w"], p["aa_b"] = aa_f[:, 1:, :], aa_f[:, 0:1, :]
    p["tab_w"], p["tab_b"] = tab_f[:, 1:, :], tab_f[:, 0:1, :]
    p["tool_w"], p["tool_b"] = tool_f[:, 1:, :], tool_f[:, 0:1, :]
    p["fusion_w"] = xavier_normal(keys[4], (1, RANK))
    p["fusion_b"] = jnp.zeros((1, OUT_DIM), jnp.float32)
    p["w1"], p["b1"] = linear_init(keys[5], 128, 512)
    p["w2"], p["b2"] = linear_init(keys[6], 512, 256)
    p["w3"], p["b3"] = linear_init(keys[7], 256, 128)
    p["w4"], p["b4"] = linear_init(keys[8], 128, 64)
    p["w5"], p["b5"] = linear_init(keys[9], 64, 1)
    return p


def pack_params(p):
    """Repack raw params into the kernel layout (done once, at trace time)."""
    bf16 = jnp.bfloat16

    def stack(w):  # [RANK, K, 128] -> [K, RANK*128]
        return jnp.concatenate([w[r] for r in range(RANK)], axis=-1)

    fw = p["fusion_w"][0]                                   # [RANK]
    seq_w, seq_b = stack(p["seq_w"]).astype(bf16), stack(p["seq_b"])
    aa_w, aa_b = stack(p["aa_w"]).astype(bf16), stack(p["aa_b"])
    tab_w, tab_b = stack(p["tab_w"]).astype(bf16), stack(p["tab_b"])

    # Fold fusion_weights into the tool factor (one scale per rank block) and
    # pad its K dim only 4 -> 8; the matching padded tool-input columns are zero.
    tool_w = stack(p["tool_w"] * fw[:, None, None])         # [4, 512]
    tool_b = stack(p["tool_b"] * fw[:, None, None])         # [1, 512]
    tool_w = (jnp.zeros((TOOL_PAD, FUSED_N), jnp.float32)
              .at[:TOOL_DIM, :].set(tool_w).astype(bf16))

    # Lane-dense tail: pad fc4 output 64 -> 128 and fc5 to [128, 128] / [1, 128].
    w4 = jnp.zeros((128, 128), jnp.float32).at[:, :64].set(p["w4"]).astype(bf16)
    b4 = jnp.zeros((1, 128), jnp.float32).at[:, :64].set(p["b4"])
    w5 = jnp.zeros((128, 128), jnp.float32).at[:64, 0:1].set(p["w5"]).astype(bf16)
    b5 = jnp.zeros((1, 128), jnp.float32).at[:, 0:1].set(p["b5"])

    return (seq_w, seq_b, aa_w, aa_b, tab_w, tab_b, tool_w, tool_b,
            p["fusion_b"],
            p["w1"].astype(bf16), p["b1"],
            p["w2"].astype(bf16), p["b2"],
            p["w3"].astype(bf16), p["b3"],
            w4, b4, w5, b5)


# ---------------------------------------------------------------------------
# Wrapper
# ---------------------------------------------------------------------------

def modvar_forward(dna_x, aa_x, tool_x, tab_x, packed, *, tile_b=512):
    """dna_x/aa_x/tab_x: [B, 128] f32, tool_x: [B, 4] f32."""
    dna_x = jnp.asarray(dna_x, jnp.float32)
    aa_x = jnp.asarray(aa_x, jnp.float32)
    tab_x = jnp.asarray(tab_x, jnp.float32)
    tool_x = jnp.asarray(tool_x, jnp.float32)
    if dna_x.ndim == 1:
        dna_x, aa_x, tab_x, tool_x = (a[None, :] for a in (dna_x, aa_x, tab_x, tool_x))
    b = dna_x.shape[0]
    assert dna_x.shape == (b, MOD_DIM) and aa_x.shape == (b, MOD_DIM)
    assert tab_x.shape == (b, MOD_DIM) and tool_x.shape == (b, TOOL_DIM)

    tb = min(tile_b, _round_up(b, 8))        # batch tile (multiple of 8)
    b_pad = _round_up(b, tb)

    def pad_rows(a, width, raw_width):
        return jnp.zeros((b_pad, width), jnp.float32).at[:b, :raw_width].set(a)

    if b_pad == b:
        dna_p, aa_p, tab_p = dna_x, aa_x, tab_x
    else:
        dna_p = pad_rows(dna_x, MOD_DIM, MOD_DIM)
        aa_p = pad_rows(aa_x, MOD_DIM, MOD_DIM)
        tab_p = pad_rows(tab_x, MOD_DIM, MOD_DIM)
    tool_p = pad_rows(tool_x, TOOL_PAD, TOOL_DIM)   # cols 4..7 must stay zero

    grid = (b_pad // tb,)

    def act_spec(width):
        return pl.BlockSpec((tb, width), lambda i: (i, 0))

    # Weights/biases: full-array blocks, constant index_map -> VMEM-resident.
    w_specs = [pl.BlockSpec(w.shape, lambda i: (0, 0)) for w in packed]
    out_spec = pl.BlockSpec((tb, OUT_DIM), lambda i: (i, 0))

    out = pl.pallas_call(
        modvar_kernel,
        out_shape=jax.ShapeDtypeStruct((b_pad, OUT_DIM), jnp.float32),
        grid=grid,
        in_specs=[act_spec(MOD_DIM), act_spec(MOD_DIM), act_spec(MOD_DIM),
                  act_spec(TOOL_PAD)] + w_specs,
        out_specs=out_spec,
        compiler_params=pltpu.CompilerParams(
            dimension_semantics=("parallel",),
            vmem_limit_bytes=32 * 1024 * 1024),
    )(dna_p, aa_p, tab_p, tool_p, *packed)
    return out[:b, 0:1]


# ---------------------------------------------------------------------------
# Pure-JAX f32 reference (mirrors the PyTorch forward with the encoder
# switches replaced by identity on pre-encoded 128-d features)
# ---------------------------------------------------------------------------

def reference_forward(dna_x, aa_x, tool_x, tab_x, params):
    dna_x = dna_x.astype(jnp.float32)
    aa_x = aa_x.astype(jnp.float32)
    tab_x = tab_x.astype(jnp.float32)
    tool_x = tool_x.astype(jnp.float32)
    acc = 0.0
    for r in range(RANK):
        fseq = dna_x @ params["seq_w"][r] + params["seq_b"][r]
        faa = aa_x @ params["aa_w"][r] + params["aa_b"][r]
        ftab = tab_x @ params["tab_w"][r] + params["tab_b"][r]
        ftool = tool_x @ params["tool_w"][r] + params["tool_b"][r]
        acc = acc + params["fusion_w"][0, r] * (fseq * faa * ftab * ftool)
    out = acc + params["fusion_b"]
    h = jax.nn.sigmoid(jnp.maximum(out @ params["w1"] + params["b1"], 0.0))
    h = jnp.maximum(h @ params["w2"] + params["b2"], 0.0)
    h = jnp.maximum(h @ params["w3"] + params["b3"], 0.0)
    h = jnp.maximum(h @ params["w4"] + params["b4"], 0.0)
    return jax.nn.sigmoid(h @ params["w5"] + params["b5"])


if __name__ == "__main__":
    key = jax.random.PRNGKey(0)
    kp, kx = jax.random.split(key)
    params = make_params(kp)
    packed = pack_params(params)

    # B=8 exercises the plain path; B=5 exercises batch-row padding/masking.
    for B in (8, 5):
        ks = jax.random.split(jax.random.fold_in(kx, B), 4)
        dna = jax.random.normal(ks[0], (B, MOD_DIM), jnp.float32)
        aa = jax.random.normal(ks[1], (B, MOD_DIM), jnp.float32)
        tab = jax.random.normal(ks[2], (B, MOD_DIM), jnp.float32)
        tool = jax.random.normal(ks[3], (B, TOOL_DIM), jnp.float32)

        out = jax.block_until_ready(modvar_forward(dna, aa, tool, tab, packed))
        ref = reference_forward(dna, aa, tool, tab, params)
        assert out.shape == (B, 1), out.shape
        # bf16 MXU operands -> relaxed tolerance vs the pure-f32 reference.
        err = float(jnp.max(jnp.abs(out - ref)))
        assert err < 5e-2, (err, out, ref)

    print("KERNEL_OK")
</pallas_src>

<mosaic_0001>
module attributes {stable_mosaic.version = 11 : i64} {
  func.func @modvar_kernel(%arg0: i32, %arg1: memref<8x128xf32, #tpu.memory_space<vmem>>, %arg2: memref<8x128xf32, #tpu.memory_space<vmem>>, %arg3: memref<8x128xf32, #tpu.memory_space<vmem>>, %arg4: memref<8x8xf32, #tpu.memory_space<vmem>>, %arg5: memref<128x512xbf16, #tpu.memory_space<vmem>>, %arg6: memref<1x512xf32, #tpu.memory_space<vmem>>, %arg7: memref<128x512xbf16, #tpu.memory_space<vmem>>, %arg8: memref<1x512xf32, #tpu.memory_space<vmem>>, %arg9: memref<128x512xbf16, #tpu.memory_space<vmem>>, %arg10: memref<1x512xf32, #tpu.memory_space<vmem>>, %arg11: memref<8x512xbf16, #tpu.memory_space<vmem>>, %arg12: memref<1x512xf32, #tpu.memory_space<vmem>>, %arg13: memref<1x128xf32, #tpu.memory_space<vmem>>, %arg14: memref<128x512xbf16, #tpu.memory_space<vmem>>, %arg15: memref<1x512xf32, #tpu.memory_space<vmem>>, %arg16: memref<512x256xbf16, #tpu.memory_space<vmem>>, %arg17: memref<1x256xf32, #tpu.memory_space<vmem>>, %arg18: memref<256x128xbf16, #tpu.memory_space<vmem>>, %arg19: memref<1x128xf32, #tpu.memory_space<vmem>>, %arg20: memref<128x128xbf16, #tpu.memory_space<vmem>>, %arg21: memref<1x128xf32, #tpu.memory_space<vmem>>, %arg22: memref<128x128xbf16, #tpu.memory_space<vmem>>, %arg23: memref<1x128xf32, #tpu.memory_space<vmem>>, %arg24: memref<8x128xf32, #tpu.memory_space<vmem>>) attributes {dimension_semantics = [#tpu.dimension_semantics<parallel>], iteration_bounds = array<i64: 1>, scalar_prefetch = 0 : i64, scratch_operands = 0 : i64, tpu.core_type = #tpu.core_type<tc>, window_params = [{transform_indices = @transform_0, window_bounds = array<i64: 8, 128>}, {transform_indices = @transform_1, window_bounds = array<i64: 8, 128>}, {transform_indices = @transform_2, window_bounds = array<i64: 8, 128>}, {transform_indices = @transform_3, window_bounds = array<i64: 8, 8>}, {pipeline_mode = #tpu.pipeline_mode<synchronous>, transform_indices = @transform_4, window_bounds = array<i64: 128, 512>}, {pipeline_mode = #tpu.pipeline_mode<synchronous>, transform_indices = @transform_5, window_bounds = array<i64: 1, 512>}, {pipeline_mode = #tpu.pipeline_mode<synchronous>, transform_indices = @transform_6, window_bounds = array<i64: 128, 512>}, {pipeline_mode = #tpu.pipeline_mode<synchronous>, transform_indices = @transform_7, window_bounds = array<i64: 1, 512>}, {pipeline_mode = #tpu.pipeline_mode<synchronous>, transform_indices = @transform_8, window_bounds = array<i64: 128, 512>}, {pipeline_mode = #tpu.pipeline_mode<synchronous>, transform_indices = @transform_9, window_bounds = array<i64: 1, 512>}, {pipeline_mode = #tpu.pipeline_mode<synchronous>, transform_indices = @transform_10, window_bounds = array<i64: 8, 512>}, {pipeline_mode = #tpu.pipeline_mode<synchronous>, transform_indices = @transform_11, window_bounds = array<i64: 1, 512>}, {pipeline_mode = #tpu.pipeline_mode<synchronous>, transform_indices = @transform_12, window_bounds = array<i64: 1, 128>}, {pipeline_mode = #tpu.pipeline_mode<synchronous>, transform_indices = @transform_13, window_bounds = array<i64: 128, 512>}, {pipeline_mode = #tpu.pipeline_mode<synchronous>, transform_indices = @transform_14, window_bounds = array<i64: 1, 512>}, {pipeline_mode = #tpu.pipeline_mode<synchronous>, transform_indices = @transform_15, window_bounds = array<i64: 512, 256>}, {pipeline_mode = #tpu.pipeline_mode<synchronous>, transform_indices = @transform_16, window_bounds = array<i64: 1, 256>}, {pipeline_mode = #tpu.pipeline_mode<synchronous>, transform_indices = @transform_17, window_bounds = array<i64: 256, 128>}, {pipeline_mode = #tpu.pipeline_mode<synchronous>, transform_indices = @transform_18, window_bounds = array<i64: 1, 128>}, {pipeline_mode = #tpu.pipeline_mode<synchronous>, transform_indices = @transform_19, window_bounds = array<i64: 128, 128>}, {pipeline_mode = #tpu.pipeline_mode<synchronous>, transform_indices = @transform_20, window_bounds = array<i64: 1, 128>}, {pipeline_mode = #tpu.pipeline_mode<synchronous>, transform_indices = @transform_21, window_bounds = array<i64: 128, 128>}, {pipeline_mode = #tpu.pipeline_mode<synchronous>, transform_indices = @transform_22, window_bounds = array<i64: 1, 128>}, {transform_indices = @transform_23, window_bounds = array<i64: 8, 128>}]} {
    %c0 = arith.constant 0 : index
    %c0_0 = arith.constant 0 : index
    %0 = vector.load %arg1[%c0, %c0_0] : memref<8x128xf32, #tpu.memory_space<vmem>>, vector<8x128xf32>
    %1 = arith.truncf %0 : vector<8x128xf32> to vector<8x128xbf16>
    %c0_1 = arith.constant 0 : index
    %c0_2 = arith.constant 0 : index
    %2 = vector.load %arg2[%c0_1, %c0_2] : memref<8x128xf32, #tpu.memory_space<vmem>>, vector<8x128xf32>
    %3 = arith.truncf %2 : vector<8x128xf32> to vector<8x128xbf16>
    %c0_3 = arith.constant 0 : index
    %c0_4 = arith.constant 0 : index
    %4 = vector.load %arg3[%c0_3, %c0_4] : memref<8x128xf32, #tpu.memory_space<vmem>>, vector<8x128xf32>
    %5 = arith.truncf %4 : vector<8x128xf32> to vector<8x128xbf16>
    %c0_5 = arith.constant 0 : index
    %c0_6 = arith.constant 0 : index
    %6 = vector.load %arg4[%c0_5, %c0_6] : memref<8x8xf32, #tpu.memory_space<vmem>>, vector<8x8xf32>
    %7 = arith.truncf %6 : vector<8x8xf32> to vector<8x8xbf16>
    %c0_7 = arith.constant 0 : index
    %c0_8 = arith.constant 0 : index
    %8 = vector.load %arg5[%c0_7, %c0_8] : memref<128x512xbf16, #tpu.memory_space<vmem>>, vector<128x512xbf16>
    %cst = arith.constant dense<0.000000e+00> : vector<8x512xf32>
    %9 = tpu.matmul %1, %8, %cst {dimension_numbers = #tpu.dot_dimension_numbers<[1], [0], [0], [1], [0, 0, 1, 1], [], []>} : vector<8x128xbf16>, vector<128x512xbf16>, vector<8x512xf32> -> vector<8x512xf32>
    %c0_9 = arith.constant 0 : index
    %c0_10 = arith.constant 0 : index
    %10 = vector.load %arg6[%c0_9, %c0_10] : memref<1x512xf32, #tpu.memory_space<vmem>>, vector<1x512xf32>
    %11 = vector.broadcast %10 : vector<1x512xf32> to vector<8x512xf32>
    %12 = arith.addf %9, %11 : vector<8x512xf32>
    %c0_11 = arith.constant 0 : index
    %c0_12 = arith.constant 0 : index
    %13 = vector.load %arg7[%c0_11, %c0_12] : memref<128x512xbf16, #tpu.memory_space<vmem>>, vector<128x512xbf16>
    %cst_13 = arith.constant dense<0.000000e+00> : vector<8x512xf32>
    %14 = tpu.matmul %3, %13, %cst_13 {dimension_numbers = #tpu.dot_dimension_numbers<[1], [0], [0], [1], [0, 0, 1, 1], [], []>} : vector<8x128xbf16>, vector<128x512xbf16>, vector<8x512xf32> -> vector<8x512xf32>
    %c0_14 = arith.constant 0 : index
    %c0_15 = arith.constant 0 : index
    %15 = vector.load %arg8[%c0_14, %c0_15] : memref<1x512xf32, #tpu.memory_space<vmem>>, vector<1x512xf32>
    %16 = vector.broadcast %15 : vector<1x512xf32> to vector<8x512xf32>
    %17 = arith.addf %14, %16 : vector<8x512xf32>
    %c0_16 = arith.constant 0 : index
    %c0_17 = arith.constant 0 : index
    %18 = vector.load %arg9[%c0_16, %c0_17] : memref<128x512xbf16, #tpu.memory_space<vmem>>, vector<128x512xbf16>
    %cst_18 = arith.constant dense<0.000000e+00> : vector<8x512xf32>
    %19 = tpu.matmul %5, %18, %cst_18 {dimension_numbers = #tpu.dot_dimension_numbers<[1], [0], [0], [1], [0, 0, 1, 1], [], []>} : vector<8x128xbf16>, vector<128x512xbf16>, vector<8x512xf32> -> vector<8x512xf32>
    %c0_19 = arith.constant 0 : index
    %c0_20 = arith.constant 0 : index
    %20 = vector.load %arg10[%c0_19, %c0_20] : memref<1x512xf32, #tpu.memory_space<vmem>>, vector<1x512xf32>
    %21 = vector.broadcast %20 : vector<1x512xf32> to vector<8x512xf32>
    %22 = arith.addf %19, %21 : vector<8x512xf32>
    %c0_21 = arith.constant 0 : index
    %c0_22 = arith.constant 0 : index
    %23 = vector.load %arg11[%c0_21, %c0_22] : memref<8x512xbf16, #tpu.memory_space<vmem>>, vector<8x512xbf16>
    %cst_23 = arith.constant dense<0.000000e+00> : vector<8x512xf32>
    %24 = tpu.matmul %7, %23, %cst_23 {dimension_numbers = #tpu.dot_dimension_numbers<[1], [0], [0], [1], [0, 0, 1, 1], [], []>} : vector<8x8xbf16>, vector<8x512xbf16>, vector<8x512xf32> -> vector<8x512xf32>
    %c0_24 = arith.constant 0 : index
    %c0_25 = arith.constant 0 : index
    %25 = vector.load %arg12[%c0_24, %c0_25] : memref<1x512xf32, #tpu.memory_space<vmem>>, vector<1x512xf32>
    %26 = vector.broadcast %25 : vector<1x512xf32> to vector<8x512xf32>
    %27 = arith.addf %24, %26 : vector<8x512xf32>
    %28 = arith.mulf %12, %17 : vector<8x512xf32>
    %29 = arith.mulf %28, %22 : vector<8x512xf32>
    %30 = arith.mulf %29, %27 : vector<8x512xf32>
    %31 = vector.extract_strided_slice %30 {offsets = [0, 0], sizes = [8, 128], strides = [1, 1]} : vector<8x512xf32> to vector<8x128xf32>
    %32 = vector.extract_strided_slice %30 {offsets = [0, 128], sizes = [8, 128], strides = [1, 1]} : vector<8x512xf32> to vector<8x128xf32>
    %33 = arith.addf %31, %32 : vector<8x128xf32>
    %34 = vector.extract_strided_slice %30 {offsets = [0, 256], sizes = [8, 128], strides = [1, 1]} : vector<8x512xf32> to vector<8x128xf32>
    %35 = arith.addf %33, %34 : vector<8x128xf32>
    %36 = vector.extract_strided_slice %30 {offsets = [0, 384], sizes = [8, 128], strides = [1, 1]} : vector<8x512xf32> to vector<8x128xf32>
    %37 = arith.addf %35, %36 : vector<8x128xf32>
    %c0_26 = arith.constant 0 : index
    %c0_27 = arith.constant 0 : index
    %38 = vector.load %arg13[%c0_26, %c0_27] : memref<1x128xf32, #tpu.memory_space<vmem>>, vector<1x128xf32>
    %39 = vector.broadcast %38 : vector<1x128xf32> to vector<8x128xf32>
    %40 = arith.addf %37, %39 : vector<8x128xf32>
    %41 = arith.truncf %40 : vector<8x128xf32> to vector<8x128xbf16>
    %c0_28 = arith.constant 0 : index
    %c0_29 = arith.constant 0 : index
    %42 = vector.load %arg14[%c0_28, %c0_29] : memref<128x512xbf16, #tpu.memory_space<vmem>>, vector<128x512xbf16>
    %cst_30 = arith.constant dense<0.000000e+00> : vector<8x512xf32>
    %43 = tpu.matmul %41, %42, %cst_30 {dimension_numbers = #tpu.dot_dimension_numbers<[1], [0], [0], [1], [0, 0, 1, 1], [], []>} : vector<8x128xbf16>, vector<128x512xbf16>, vector<8x512xf32> -> vector<8x512xf32>
    %c0_31 = arith.constant 0 : index
    %c0_32 = arith.constant 0 : index
    %44 = vector.load %arg15[%c0_31, %c0_32] : memref<1x512xf32, #tpu.memory_space<vmem>>, vector<1x512xf32>
    %45 = vector.broadcast %44 : vector<1x512xf32> to vector<8x512xf32>
    %46 = arith.addf %43, %45 : vector<8x512xf32>
    %cst_33 = arith.constant 0.000000e+00 : f32
    %47 = vector.broadcast %cst_33 : f32 to vector<8x512xf32>
    %48 = arith.maximumf %46, %47 : vector<8x512xf32>
    %49 = arith.negf %48 : vector<8x512xf32>
    %50 = math.exp %49 : vector<8x512xf32>
    %cst_34 = arith.constant 1.000000e+00 : f32
    %51 = vector.broadcast %cst_34 : f32 to vector<8x512xf32>
    %52 = arith.addf %51, %50 : vector<8x512xf32>
    %53 = arith.divf %51, %52 : vector<8x512xf32>
    %54 = arith.truncf %53 : vector<8x512xf32> to vector<8x512xbf16>
    %c0_35 = arith.constant 0 : index
    %c0_36 = arith.constant 0 : index
    %55 = vector.load %arg16[%c0_35, %c0_36] : memref<512x256xbf16, #tpu.memory_space<vmem>>, vector<512x256xbf16>
    %cst_37 = arith.constant dense<0.000000e+00> : vector<8x256xf32>
    %56 = tpu.matmul %54, %55, %cst_37 {dimension_numbers = #tpu.dot_dimension_numbers<[1], [0], [0], [1], [0, 0, 1, 1], [], []>} : vector<8x512xbf16>, vector<512x256xbf16>, vector<8x256xf32> -> vector<8x256xf32>
    %c0_38 = arith.constant 0 : index
    %c0_39 = arith.constant 0 : index
    %57 = vector.load %arg17[%c0_38, %c0_39] : memref<1x256xf32, #tpu.memory_space<vmem>>, vector<1x256xf32>
    %58 = vector.broadcast %57 : vector<1x256xf32> to vector<8x256xf32>
    %59 = arith.addf %56, %58 : vector<8x256xf32>
    %cst_40 = arith.constant 0.000000e+00 : f32
    %60 = vector.broadcast %cst_40 : f32 to vector<8x256xf32>
    %61 = arith.maximumf %59, %60 : vector<8x256xf32>
    %62 = arith.truncf %61 : vector<8x256xf32> to vector<8x256xbf16>
    %c0_41 = arith.constant 0 : index
    %c0_42 = arith.constant 0 : index
    %63 = vector.load %arg18[%c0_41, %c0_42] : memref<256x128xbf16, #tpu.memory_space<vmem>>, vector<256x128xbf16>
    %cst_43 = arith.constant dense<0.000000e+00> : vector<8x128xf32>
    %64 = tpu.matmul %62, %63, %cst_43 {dimension_numbers = #tpu.dot_dimension_numbers<[1], [0], [0], [1], [0, 0, 1, 1], [], []>} : vector<8x256xbf16>, vector<256x128xbf16>, vector<8x128xf32> -> vector<8x128xf32>
    %c0_44 = arith.constant 0 : index
    %c0_45 = arith.constant 0 : index
    %65 = vector.load %arg19[%c0_44, %c0_45] : memref<1x128xf32, #tpu.memory_space<vmem>>, vector<1x128xf32>
    %66 = vector.broadcast %65 : vector<1x128xf32> to vector<8x128xf32>
    %67 = arith.addf %64, %66 : vector<8x128xf32>
    %cst_46 = arith.constant 0.000000e+00 : f32
    %68 = vector.broadcast %cst_46 : f32 to vector<8x128xf32>
    %69 = arith.maximumf %67, %68 : vector<8x128xf32>
    %70 = arith.truncf %69 : vector<8x128xf32> to vector<8x128xbf16>
    %c0_47 = arith.constant 0 : index
    %c0_48 = arith.constant 0 : index
    %71 = vector.load %arg20[%c0_47, %c0_48] : memref<128x128xbf16, #tpu.memory_space<vmem>>, vector<128x128xbf16>
    %cst_49 = arith.constant dense<0.000000e+00> : vector<8x128xf32>
    %72 = tpu.matmul %70, %71, %cst_49 {dimension_numbers = #tpu.dot_dimension_numbers<[1], [0], [0], [1], [0, 0, 1, 1], [], []>} : vector<8x128xbf16>, vector<128x128xbf16>, vector<8x128xf32> -> vector<8x128xf32>
    %c0_50 = arith.constant 0 : index
    %c0_51 = arith.constant 0 : index
    %73 = vector.load %arg21[%c0_50, %c0_51] : memref<1x128xf32, #tpu.memory_space<vmem>>, vector<1x128xf32>
    %74 = vector.broadcast %73 : vector<1x128xf32> to vector<8x128xf32>
    %75 = arith.addf %72, %74 : vector<8x128xf32>
    %cst_52 = arith.constant 0.000000e+00 : f32
    %76 = vector.broadcast %cst_52 : f32 to vector<8x128xf32>
    %77 = arith.maximumf %75, %76 : vector<8x128xf32>
    %78 = arith.truncf %77 : vector<8x128xf32> to vector<8x128xbf16>
    %c0_53 = arith.constant 0 : index
    %c0_54 = arith.constant 0 : index
    %79 = vector.load %arg22[%c0_53, %c0_54] : memref<128x128xbf16, #tpu.memory_space<vmem>>, vector<128x128xbf16>
    %cst_55 = arith.constant dense<0.000000e+00> : vector<8x128xf32>
    %80 = tpu.matmul %78, %79, %cst_55 {dimension_numbers = #tpu.dot_dimension_numbers<[1], [0], [0], [1], [0, 0, 1, 1], [], []>} : vector<8x128xbf16>, vector<128x128xbf16>, vector<8x128xf32> -> vector<8x128xf32>
    %c0_56 = arith.constant 0 : index
    %c0_57 = arith.constant 0 : index
    %81 = vector.load %arg23[%c0_56, %c0_57] : memref<1x128xf32, #tpu.memory_space<vmem>>, vector<1x128xf32>
    %82 = vector.broadcast %81 : vector<1x128xf32> to vector<8x128xf32>
    %83 = arith.addf %80, %82 : vector<8x128xf32>
    %84 = arith.negf %83 : vector<8x128xf32>
    %85 = math.exp %84 : vector<8x128xf32>
    %cst_58 = arith.constant 1.000000e+00 : f32
    %86 = vector.broadcast %cst_58 : f32 to vector<8x128xf32>
    %87 = arith.addf %86, %85 : vector<8x128xf32>
    %88 = arith.divf %86, %87 : vector<8x128xf32>
    %c0_59 = arith.constant 0 : index
    %c0_60 = arith.constant 0 : index
    %89 = vector.load %arg24[%c0_59, %c0_60] : memref<8x128xf32, #tpu.memory_space<vmem>>, vector<8x128xf32>
    tpu.vector_store %arg24[%c0_59, %c0_60], %88 {strides = array<i32>} : memref<8x128xf32, #tpu.memory_space<vmem>>, vector<8x128xf32>,
    return
  }
  func.func @transform_0(%arg0: i32) -> (i32, i32) {
    %c0_i32 = arith.constant 0 : i32
    %c0_i32_0 = arith.constant 0 : i32
    return %arg0, %c0_i32 : i32, i32
  }
  func.func @transform_1(%arg0: i32) -> (i32, i32) {
    %c0_i32 = arith.constant 0 : i32
    %c0_i32_0 = arith.constant 0 : i32
    return %arg0, %c0_i32 : i32, i32
  }
  func.func @transform_2(%arg0: i32) -> (i32, i32) {
    %c0_i32 = arith.constant 0 : i32
    %c0_i32_0 = arith.constant 0 : i32
    return %arg0, %c0_i32 : i32, i32
  }
  func.func @transform_3(%arg0: i32) -> (i32, i32) {
    %c0_i32 = arith.constant 0 : i32
    %c0_i32_0 = arith.constant 0 : i32
    return %arg0, %c0_i32 : i32, i32
  }
  func.func @transform_4(%arg0: i32) -> (i32, i32) {
    %c0_i32 = arith.constant 0 : i32
    %c0_i32_0 = arith.constant 0 : i32
    %c0_i32_1 = arith.constant 0 : i32
    return %c0_i32, %c0_i32_0 : i32, i32
  }
  func.func @transform_5(%arg0: i32) -> (i32, i32) {
    %c0_i32 = arith.constant 0 : i32
    %c0_i32_0 = arith.constant 0 : i32
    %c0_i32_1 = arith.constant 0 : i32
    return %c0_i32, %c0_i32_0 : i32, i32
  }
  func.func @transform_6(%arg0: i32) -> (i32, i32) {
    %c0_i32 = arith.constant 0 : i32
    %c0_i32_0 = arith.constant 0 : i32
    %c0_i32_1 = arith.constant 0 : i32
    return %c0_i32, %c0_i32_0 : i32, i32
  }
  func.func @transform_7(%arg0: i32) -> (i32, i32) {
    %c0_i32 = arith.constant 0 : i32
    %c0_i32_0 = arith.constant 0 : i32
    %c0_i32_1 = arith.constant 0 : i32
    return %c0_i32, %c0_i32_0 : i32, i32
  }
  func.func @transform_8(%arg0: i32) -> (i32, i32) {
    %c0_i32 = arith.constant 0 : i32
    %c0_i32_0 = arith.constant 0 : i32
    %c0_i32_1 = arith.constant 0 : i32
    return %c0_i32, %c0_i32_0 : i32, i32
  }
  func.func @transform_9(%arg0: i32) -> (i32, i32) {
    %c0_i32 = arith.constant 0 : i32
    %c0_i32_0 = arith.constant 0 : i32
    %c0_i32_1 = arith.constant 0 : i32
    return %c0_i32, %c0_i32_0 : i32, i32
  }
  func.func @transform_10(%arg0: i32) -> (i32, i32) {
    %c0_i32 = arith.constant 0 : i32
    %c0_i32_0 = arith.constant 0 : i32
    %c0_i32_1 = arith.constant 0 : i32
    return %c0_i32, %c0_i32_0 : i32, i32
  }
  func.func @transform_11(%arg0: i32) -> (i32, i32) {
    %c0_i32 = arith.constant 0 : i32
    %c0_i32_0 = arith.constant 0 : i32
    %c0_i32_1 = arith.constant 0 : i32
    return %c0_i32, %c0_i32_0 : i32, i32
  }
  func.func @transform_12(%arg0: i32) -> (i32, i32) {
    %c0_i32 = arith.constant 0 : i32
    %c0_i32_0 = arith.constant 0 : i32
    %c0_i32_1 = arith.constant 0 : i32
    return %c0_i32, %c0_i32_0 : i32, i32
  }
  func.func @transform_13(%arg0: i32) -> (i32, i32) {
    %c0_i32 = arith.constant 0 : i32
    %c0_i32_0 = arith.constant 0 : i32
    %c0_i32_1 = arith.constant 0 : i32
    return %c0_i32, %c0_i32_0 : i32, i32
  }
  func.func @transform_14(%arg0: i32) -> (i32, i32) {
    %c0_i32 = arith.constant 0 : i32
    %c0_i32_0 = arith.constant 0 : i32
    %c0_i32_1 = arith.constant 0 : i32
    return %c0_i32, %c0_i32_0 : i32, i32
  }
  func.func @transform_15(%arg0: i32) -> (i32, i32) {
    %c0_i32 = arith.constant 0 : i32
    %c0_i32_0 = arith.constant 0 : i32
    %c0_i32_1 = arith.constant 0 : i32
    return %c0_i32, %c0_i32_0 : i32, i32
  }
  func.func @transform_16(%arg0: i32) -> (i32, i32) {
    %c0_i32 = arith.constant 0 : i32
    %c0_i32_0 = arith.constant 0 : i32
    %c0_i32_1 = arith.constant 0 : i32
    return %c0_i32, %c0_i32_0 : i32, i32
  }
  func.func @transform_17(%arg0: i32) -> (i32, i32) {
    %c0_i32 = arith.constant 0 : i32
    %c0_i32_0 = arith.constant 0 : i32
    %c0_i32_1 = arith.constant 0 : i32
    return %c0_i32, %c0_i32_0 : i32, i32
  }
  func.func @transform_18(%arg0: i32) -> (i32, i32) {
    %c0_i32 = arith.constant 0 : i32
    %c0_i32_0 = arith.constant 0 : i32
    %c0_i32_1 = arith.constant 0 : i32
    return %c0_i32, %c0_i32_0 : i32, i32
  }
  func.func @transform_19(%arg0: i32) -> (i32, i32) {
    %c0_i32 = arith.constant 0 : i32
    %c0_i32_0 = arith.constant 0 : i32
    %c0_i32_1 = arith.constant 0 : i32
    return %c0_i32, %c0_i32_0 : i32, i32
  }
  func.func @transform_20(%arg0: i32) -> (i32, i32) {
    %c0_i32 = arith.constant 0 : i32
    %c0_i32_0 = arith.constant 0 : i32
    %c0_i32_1 = arith.constant 0 : i32
    return %c0_i32, %c0_i32_0 : i32, i32
  }
  func.func @transform_21(%arg0: i32) -> (i32, i32) {
    %c0_i32 = arith.constant 0 : i32
    %c0_i32_0 = arith.constant 0 : i32
    %c0_i32_1 = arith.constant 0 : i32
    return %c0_i32, %c0_i32_0 : i32, i32
  }
  func.func @transform_22(%arg0: i32) -> (i32, i32) {
    %c0_i32 = arith.constant 0 : i32
    %c0_i32_0 = arith.constant 0 : i32
    %c0_i32_1 = arith.constant 0 : i32
    return %c0_i32, %c0_i32_0 : i32, i32
  }
  func.func @transform_23(%arg0: i32) -> (i32, i32) {
    %c0_i32 = arith.constant 0 : i32
    %c0_i32_0 = arith.constant 0 : i32
    return %arg0, %c0_i32 : i32, i32
  }
}

</mosaic_0001>

<bundles_post_ra>
// kernel: tpu_custom_call.1
= control target key start
LH: loop header
LB: loop body
LE: loop exit
PB: predicated region body
PF: predicated region fallthrough
CT: control target
= control target key end

     0   :  { %s4186_s0 = inlined_call_operand.hbm [shape: f32[8,128], index: 0, kind: input, shape index: {}]   ;;  %s4187_s1 = inlined_call_operand.hbm [shape: f32[8,128], index: 1, kind: input, shape index: {}]   ;;  %s4188_s2 = inlined_call_operand.hbm [shape: f32[8,128], index: 2, kind: input, shape index: {}]   ;;  %s4189_s3 = inlined_call_operand.hbm [shape: f32[8,8], index: 3, kind: input, shape index: {}]   ;;  %s4190_s4 = inlined_call_operand.hbm [shape: bf16[128,512], index: 4, kind: input, shape index: {}]   ;;  %s4191_s5 = inlined_call_operand.vmem [shape: f32[1,512], index: 5, kind: input, shape index: {}]   ;;  %s4192_s6 = inlined_call_operand.hbm [shape: bf16[128,512], index: 6, kind: input, shape index: {}]   ;;  %s4193_s7 = inlined_call_operand.hbm [shape: f32[1,512], index: 7, kind: input, shape index: {}]   ;;  %s4194_s8 = inlined_call_operand.hbm [shape: bf16[128,512], index: 8, kind: input, shape index: {}]   ;;  %s4195_s9 = inlined_call_operand.hbm [shape: f32[1,512], index: 9, kind: input, shape index: {}]   ;;  %s4196_s10 = inlined_call_operand.hbm [shape: bf16[8,512], index: 10, kind: input, shape index: {}]   ;;  %s4197_s11 = inlined_call_operand.hbm [shape: f32[1,512], index: 11, kind: input, shape index: {}]   ;;  %s4198_s12 = inlined_call_operand.vmem [shape: f32[1,128], index: 12, kind: input, shape index: {}]   ;;  %s4199_s13 = inlined_call_operand.hbm [shape: bf16[128,512], index: 13, kind: input, shape index: {}]   ;;  %s4200_s14 = inlined_call_operand.hbm [shape: f32[1,512], index: 14, kind: input, shape index: {}]   ;;  %s4201_s15 = inlined_call_operand.hbm [shape: bf16[512,256], index: 15, kind: input, shape index: {}]   ;;  %s4202_s16 = inlined_call_operand.vmem [shape: f32[1,256], index: 16, kind: input, shape index: {}]   ;;  %s4203_s17 = inlined_call_operand.hbm [shape: bf16[256,128], index: 17, kind: input, shape index: {}]   ;;  %s4204_s18 = inlined_call_operand.hbm [shape: f32[1,128], index: 18, kind: input, shape index: {}]   ;;  %s4205_s19 = inlined_call_operand.vmem [shape: bf16[128,128], index: 19, kind: input, shape index: {}]   ;;  %s4206_s20 = inlined_call_operand.vmem [shape: f32[1,128], index: 20, kind: input, shape index: {}]   ;;  %s4207_s21 = inlined_call_operand.hbm [shape: bf16[128,128], index: 21, kind: input, shape index: {}]   ;;  %s4208_s22 = inlined_call_operand.vmem [shape: f32[1,128], index: 22, kind: input, shape index: {}]   ;;  %s4209_s23 = inlined_call_operand.hbm [shape: f32[8,128], index: 23, kind: output, shape index: {}]  }
   0x1   :  { %4218 = sst [smem:[#allocation40_spill]] %s4186_s0 }
   0x2   :  { %4219 = sst [smem:[#allocation41_spill]] %s4187_s1 }
   0x3   :  { %4220 = sst [smem:[#allocation42_spill]] %s4188_s2 }
   0x4   :  { %4221 = sst [smem:[#allocation43_spill]] %s4189_s3 }
   0x5   :  { %4222 = sst [smem:[#allocation44_spill]] %s4190_s4 }
   0x6   :  { %4223 = sst [smem:[#allocation45_spill]] %s4191_s5 }
   0x7   :  { %4224 = sst [smem:[#allocation46_spill]] %s4192_s6 }
   0x8   :  { %4225 = sst [smem:[#allocation47_spill]] %s4193_s7 }
   0x9   :  { %4226 = sst [smem:[#allocation48_spill]] %s4209_s23 }
   0xa   :  { %28 = vsyncpa [#allocation3], 0 }
   0xb   :  { %29 = vsyncpa [#allocation6], 0 }
   0xc   :  { %30 = vsyncpa [#allocation9], 0 }
   0xd   :  { %31 = vsyncpa [#allocation12], 0 }
   0xe   :  { %32 = vsyncpa [#allocation15], 0 }
   0xf   :  { %33 = vsyncpa [#allocation18], 0 }
  0x10   :  { %34 = vsyncpa [#allocation21], 0 }
  0x11   :  { %35 = vsyncpa [#allocation24], 0 }
  0x12   :  { %36 = vsyncpa [#allocation27], 0 }
  0x13   :  { %37 = vsyncpa [#allocation4], 0  ;;  %s3694_s4 = smov [#allocation5]   ;;  %s3695_s24 = smov [#allocation8]  }
  0x14   :  { %s54_s30 = sshll.u32 %s3694_s4, 4  ;;  %s74_s25 = sshll.u32 %s3695_s24, 4  ;;  %s55_s30 = int_to_ptr.vmem [resolvable:$true] %s54_s30  ;;  %s75_s25 = int_to_ptr.vmem [resolvable:$true] %s74_s25 }
  0x15   :  { %s4227_s26 = sld [smem:[#allocation41_spill]] }
  0x1b   :  { %s3278_s2 = scalar_lea.hbm %s4227_s26, 128 }
  0x1c   :  { %p3279_p0 = scmp.ne.s32.totalorder %s4227_s26, %s3278_s2  ;;  %p3282_p1 = scmp.lt.u32.totalorder %s3278_s2, %s4227_s26 }
  0x1e   :  { %p3284_p2 = pnand %p3282_p1, %p3279_p0 }
  0x20   :  { %3287 = shalt.err (!%p3284_p2)
}
  0x21   :  { %s3288_s29 = scalar_lea.vmem %s55_s30, 128  ;;  %p3293_p4 = scmp.lt.s32.totalorder %s55_s30, %s55_s30 }
  0x22   :  { %p3289_p3 = scmp.ne.s32.totalorder %s55_s30, %s3288_s29  ;;  %p3294_p5 = scmp.lt.s32.totalorder %s3288_s29, %s3288_s29 }
  0x24   :  { %p3295_p6 = por %p3294_p5, %p3293_p4 }
  0x26   :  { %p3296_p7 = pnand %p3295_p6, %p3289_p3 }
  0x28   :  { %3299 = shalt.err (!%p3296_p7)
}
  0x29   :  { %57 = dma.hbm_to_vmem [thread:$0]  %s4227_s26, 128, %s55_s30, [#allocation6]  }
  0x2a   :  { %s4228_s5 = sld [smem:[#allocation43_spill]] }
  0x30   :  { %s3300_s1 = scalar_lea.hbm %s4228_s5, 128 }
  0x31   :  { %p3301_p8 = scmp.ne.s32.totalorder %s4228_s5, %s3300_s1  ;;  %p3304_p9 = scmp.lt.u32.totalorder %s3300_s1, %s4228_s5 }
  0x33   :  { %p3306_p10 = pnand %p3304_p9, %p3301_p8 }
  0x35   :  { %3309 = shalt.err (!%p3306_p10)
}
  0x36   :  { %s3310_s28 = scalar_lea.vmem %s75_s25, 128  ;;  %p3315_p12 = scmp.lt.s32.totalorder %s75_s25, %s75_s25 }
  0x37   :  { %p3311_p11 = scmp.ne.s32.totalorder %s75_s25, %s3310_s28  ;;  %p3316_p13 = scmp.lt.s32.totalorder %s3310_s28, %s3310_s28 }
  0x39   :  { %p3317_p0 = por %p3316_p13, %p3315_p12 }
  0x3b   :  { %p3318_p1 = pnand %p3317_p0, %p3311_p11 }
  0x3d   :  { %3321 = shalt.err (!%p3318_p1)
}
  0x3e   :  { %77 = dma.hbm_to_vmem [thread:$0]  %s4228_s5, 128, %s75_s25, [#allocation9]  }
  0x3f   :  { %s3696_s29 = smov [#allocation11]   ;;  %s3697_s0 = smov [#allocation14]  }
  0x40   :  { %s97_s3 = sshll.u32 %s3696_s29, 4  ;;  %s119_s4 = sshll.u32 %s3697_s0, 4  ;;  %s98_s3 = int_to_ptr.vmem [resolvable:$true] %s97_s3  ;;  %s3865_s4 = int_to_ptr.vmem [resolvable:$true] %s119_s4 }
  0x41   :  { %s4229_s6 = sld [smem:[#allocation46_spill]] }
  0x47   :  { %s3322_s27 = scalar_lea.hbm %s4229_s6, 4096 }
  0x48   :  { %p3323_p2 = scmp.ne.s32.totalorder %s4229_s6, %s3322_s27  ;;  %p3326_p3 = scmp.lt.u32.totalorder %s3322_s27, %s4229_s6 }
  0x4a   :  { %p3328_p4 = pnand %p3326_p3, %p3323_p2 }
  0x4c   :  { %3331 = shalt.err (!%p3328_p4)
}
  0x4d   :  { %s3332_s25 = scalar_lea.vmem %s98_s3, 4096  ;;  %p3337_p6 = scmp.lt.s32.totalorder %s98_s3, %s98_s3 }
  0x4e   :  { %p3333_p5 = scmp.ne.s32.totalorder %s98_s3, %s3332_s25  ;;  %p3338_p7 = scmp.lt.s32.totalorder %s3332_s25, %s3332_s25 }
  0x50   :  { %p3339_p8 = por %p3338_p7, %p3337_p6 }
  0x52   :  { %p3340_p9 = pnand %p3339_p8, %p3333_p5 }
  0x54   :  { %3343 = shalt.err (!%p3340_p9)
}
  0x55   :  { %s3698_s5 = smov 256   ;;  %s3699_s30 = smov 16  }
  0x56   :  { %103 = dma.hbm_to_vmem [thread:$0]  %s4229_s6, 4096, %s98_s3, [#allocation12], %s3698_s5, %s3698_s5, %s3699_s30  }
  0x57   :  { %s3344_s24 = scalar_lea.hbm %s4194_s8, 4096 }
  0x58   :  { %p3345_p10 = scmp.ne.s32.totalorder %s4194_s8, %s3344_s24  ;;  %p3348_p11 = scmp.lt.u32.totalorder %s3344_s24, %s4194_s8 }
  0x5a   :  { %p3350_p12 = pnand %p3348_p11, %p3345_p10 }
  0x5c   :  { %3353 = shalt.err (!%p3350_p12)
}
  0x5d   :  { %s3354_s28 = scalar_lea.vmem %s3865_s4, 4096  ;;  %p3359_p0 = scmp.lt.s32.totalorder %s3865_s4, %s3865_s4 }
  0x5e   :  { %p3355_p13 = scmp.ne.s32.totalorder %s3865_s4, %s3354_s28  ;;  %p3360_p1 = scmp.lt.s32.totalorder %s3354_s28, %s3354_s28 }
  0x60   :  { %p3361_p2 = por %p3360_p1, %p3359_p0 }
  0x62   :  { %p3362_p3 = pnand %p3361_p2, %p3355_p13 }
  0x64   :  { %3365 = shalt.err (!%p3362_p3)
}
  0x65   :  { %125 = dma.hbm_to_vmem [thread:$0]  %s4194_s8, 4096, %s3865_s4, [#allocation15], %s3698_s5, %s3698_s5, %s3699_s30  }
  0x66   :  { %s3700_s25 = smov [#allocation17]   ;;  %s3701_s29 = smov [#allocation20]  }
  0x67   :  { %s142_s26 = sshll.u32 %s3700_s25, 4  ;;  %s163_s23 = sshll.u32 %s3701_s29, 4  ;;  %s143_s26 = int_to_ptr.vmem [resolvable:$true] %s142_s26  ;;  %s3902_s23 = int_to_ptr.vmem [resolvable:$true] %s163_s23 }
  0x68   :  { %s3366_s1 = scalar_lea.hbm %s4196_s10, 256 }
  0x69   :  { %p3367_p4 = scmp.ne.s32.totalorder %s4196_s10, %s3366_s1  ;;  %p3370_p5 = scmp.lt.u32.totalorder %s3366_s1, %s4196_s10 }
  0x6b   :  { %p3372_p6 = pnand %p3370_p5, %p3367_p4 }
  0x6d   :  { %3375 = shalt.err (!%p3372_p6)
}
  0x6e   :  { %s3376_s8 = scalar_lea.vmem %s143_s26, 256  ;;  %p3381_p8 = scmp.lt.s32.totalorder %s143_s26, %s143_s26 }
  0x6f   :  { %p3377_p7 = scmp.ne.s32.totalorder %s143_s26, %s3376_s8  ;;  %p3382_p9 = scmp.lt.s32.totalorder %s3376_s8, %s3376_s8 }
  0x71   :  { %p3383_p10 = por %p3382_p9, %p3381_p8 }
  0x73   :  { %p3384_p11 = pnand %p3383_p10, %p3377_p7 }
  0x75   :  { %3387 = shalt.err (!%p3384_p11)
}
  0x76   :  { %145 = dma.hbm_to_vmem [thread:$0]  %s4196_s10, 256, %s143_s26, [#allocation18]  }
  0x77   :  { %s3388_s29 = scalar_lea.hbm %s4199_s13, 4096 }
  0x78   :  { %p3389_p12 = scmp.ne.s32.totalorder %s4199_s13, %s3388_s29  ;;  %p3392_p13 = scmp.lt.u32.totalorder %s3388_s29, %s4199_s13 }
  0x7a   :  { %p3394_p0 = pnand %p3392_p13, %p3389_p12 }
  0x7c   :  { %3397 = shalt.err (!%p3394_p0)
}
  0x7d   :  { %s3398_s2 = scalar_lea.vmem %s3902_s23, 4096  ;;  %p3403_p2 = scmp.lt.s32.totalorder %s3902_s23, %s3902_s23 }
  0x7e   :  { %p3399_p1 = scmp.ne.s32.totalorder %s3902_s23, %s3398_s2  ;;  %p3404_p3 = scmp.lt.s32.totalorder %s3398_s2, %s3398_s2 }
  0x80   :  { %p3405_p4 = por %p3404_p3, %p3403_p2 }
  0x82   :  { %p3406_p5 = pnand %p3405_p4, %p3399_p1 }
  0x84   :  { %3409 = shalt.err (!%p3406_p5)
}
  0x85   :  { %169 = dma.hbm_to_vmem [thread:$0]  %s4199_s13, 4096, %s3902_s23, [#allocation21], %s3698_s5, %s3698_s5, %s3699_s30  }
  0x86   :  { %s3702_s7 = smov [#allocation23]   ;;  %s3410_s3 = scalar_lea.hbm %s4201_s15, 8192 }
  0x87   :  { %s185_s28 = sshll.u32 %s3702_s7, 4  ;;  %p3411_p6 = scmp.ne.s32.totalorder %s4201_s15, %s3410_s3  ;;  %s186_s28 = int_to_ptr.vmem [resolvable:$true] %s185_s28 }
  0x88   :  { %p3414_p7 = scmp.lt.u32.totalorder %s3410_s3, %s4201_s15 }
  0x8a   :  { %p3416_p8 = pnand %p3414_p7, %p3411_p6 }
  0x8c   :  { %3419 = shalt.err (!%p3416_p8)
}
  0x8d   :  { %s3420_s24 = scalar_lea.vmem %s186_s28, 8192  ;;  %p3425_p10 = scmp.lt.s32.totalorder %s186_s28, %s186_s28 }
  0x8e   :  { %p3421_p9 = scmp.ne.s32.totalorder %s186_s28, %s3420_s24  ;;  %p3426_p11 = scmp.lt.s32.totalorder %s3420_s24, %s3420_s24 }
  0x90   :  { %p3427_p12 = por %p3426_p11, %p3425_p10 }
  0x92   :  { %p3428_p13 = pnand %p3427_p12, %p3421_p9 }
  0x94   :  { %3431 = shalt.err (!%p3428_p13)
}
  0x95   :  { %s3703_s13 = smov 128   ;;  %s3704_s23 = smov 8  }
  0x96   :  { %191 = dma.hbm_to_vmem [thread:$0]  %s4201_s15, 8192, %s186_s28, [#allocation24], %s3703_s13, %s3703_s13, %s3704_s23  }
  0x97   :  { %s3705_s2 = smov [#allocation26]   ;;  %s3706_s26 = smov [#allocation2]  }
  0x98   :  { %s212_s10 = sshll.u32 %s3705_s2, 4  ;;  %s44_s7 = sshll.u32 %s3706_s26, 4  ;;  %s213_s10 = int_to_ptr.vmem [resolvable:$true] %s212_s10  ;;  %s45_s7 = int_to_ptr.vmem [resolvable:$true] %s44_s7 }
  0x99   :  { %s3432_s3 = scalar_lea.hbm %s4204_s18, 16 }
  0x9a   :  { %p3433_p0 = scmp.ne.s32.totalorder %s4204_s18, %s3432_s3  ;;  %p3436_p1 = scmp.lt.u32.totalorder %s3432_s3, %s4204_s18 }
  0x9c   :  { %p3438_p2 = pnand %p3436_p1, %p3433_p0 }
  0x9e   :  { %3441 = shalt.err (!%p3438_p2)
}
  0x9f   :  { %s3442_s15 = scalar_lea.vmem %s213_s10, 16  ;;  %s3446_s28 = scalar_lea.vmem %s213_s10, 32 }
  0xa0   :  { %p3443_p3 = scmp.ne.s32.totalorder %s213_s10, %s3442_s15  ;;  %p3447_p4 = scmp.lt.s32.totalorder %s213_s10, %s213_s10 }
  0xa1   :  { %p3448_p5 = scmp.lt.s32.totalorder %s3446_s28, %s3442_s15 }
  0xa3   :  { %p3449_p6 = por %p3448_p5, %p3447_p4 }
  0xa5   :  { %p3450_p7 = pnand %p3449_p6, %p3443_p3 }
  0xa7   :  { %3453 = shalt.err (!%p3450_p7)
}
  0xa8   :  { %215 = dma.hbm_to_vmem [thread:$0]  %s4204_s18, 16, %s213_s10, [#allocation27]  }
  0xa9   :  { %s4230_s27 = sld [smem:[#allocation40_spill]] }
  0xaf   :  { %s3454_s2 = scalar_lea.hbm %s4230_s27, 128 }
  0xb0   :  { %p3455_p8 = scmp.ne.s32.totalorder %s4230_s27, %s3454_s2  ;;  %p3458_p9 = scmp.lt.u32.totalorder %s3454_s2, %s4230_s27 }
  0xb2   :  { %p3460_p10 = pnand %p3458_p9, %p3455_p8 }
  0xb4   :  { %3463 = shalt.err (!%p3460_p10)
}
  0xb5   :  { %s3464_s6 = scalar_lea.vmem %s45_s7, 128  ;;  %p3469_p12 = scmp.lt.s32.totalorder %s45_s7, %s45_s7 }
  0xb6   :  { %p3465_p11 = scmp.ne.s32.totalorder %s45_s7, %s3464_s6  ;;  %p3470_p13 = scmp.lt.s32.totalorder %s3464_s6, %s3464_s6 }
  0xb8   :  { %p3471_p0 = por %p3470_p13, %p3469_p12 }
  0xba   :  { %p3472_p1 = pnand %p3471_p0, %p3465_p11 }
  0xbc   :  { %3475 = shalt.err (!%p3472_p1)
}
  0xbd   :  { %47 = dma.hbm_to_vmem [thread:$0]  %s4230_s27, 128, %s45_s7, [#allocation3]  }
  0xbe   :  { %s3707_s25 = smov [#allocation7]   ;;  %s3708_s0 = smov [#allocation10]  }
  0xbf   :  { %s64_s29 = sshll.u32 %s3707_s25, 4  ;;  %s83_s15 = sshll.u32 %s3708_s0, 4  ;;  %s65_s29 = int_to_ptr.vmem [resolvable:$true] %s64_s29  ;;  %s84_s15 = int_to_ptr.vmem [resolvable:$true] %s83_s15 }
  0xc0   :  { %s4231_s13 = sld [smem:[#allocation42_spill]] }
  0xc6   :  { %s3476_s23 = scalar_lea.hbm %s4231_s13, 128 }
  0xc7   :  { %p3477_p2 = scmp.ne.s32.totalorder %s4231_s13, %s3476_s23  ;;  %p3480_p3 = scmp.lt.u32.totalorder %s3476_s23, %s4231_s13 }
  0xc9   :  { %p3482_p4 = pnand %p3480_p3, %p3477_p2 }
  0xcb   :  { %3485 = shalt.err (!%p3482_p4)
}
  0xcc   :  { %s3486_s7 = scalar_lea.vmem %s65_s29, 128  ;;  %p3491_p6 = scmp.lt.s32.totalorder %s65_s29, %s65_s29 }
  0xcd   :  { %p3487_p5 = scmp.ne.s32.totalorder %s65_s29, %s3486_s7  ;;  %p3492_p7 = scmp.lt.s32.totalorder %s3486_s7, %s3486_s7 }
  0xcf   :  { %p3493_p8 = por %p3492_p7, %p3491_p6 }
  0xd1   :  { %p3494_p9 = pnand %p3493_p8, %p3487_p5 }
  0xd3   :  { %3497 = shalt.err (!%p3494_p9)
}
  0xd4   :  { %67 = dma.hbm_to_vmem [thread:$0]  %s4231_s13, 128, %s65_s29, [#allocation6]  }
  0xd5   :  { %s4232_s18 = sld [smem:[#allocation44_spill]] }
  0xdb   :  { %s3498_s10 = scalar_lea.hbm %s4232_s18, 4096 }
  0xdc   :  { %p3499_p10 = scmp.ne.s32.totalorder %s4232_s18, %s3498_s10  ;;  %p3502_p11 = scmp.lt.u32.totalorder %s3498_s10, %s4232_s18 }
  0xde   :  { %p3504_p12 = pnand %p3502_p11, %p3499_p10 }
  0xe0   :  { %3507 = shalt.err (!%p3504_p12)
}
  0xe1   :  { %s3508_s23 = scalar_lea.vmem %s84_s15, 4096  ;;  %p3513_p0 = scmp.lt.s32.totalorder %s84_s15, %s84_s15 }
  0xe2   :  { %p3509_p13 = scmp.ne.s32.totalorder %s84_s15, %s3508_s23  ;;  %p3514_p1 = scmp.lt.s32.totalorder %s3508_s23, %s3508_s23 }
  0xe4   :  { %p3515_p2 = por %p3514_p1, %p3513_p0 }
  0xe6   :  { %p3516_p3 = pnand %p3515_p2, %p3509_p13 }
  0xe8   :  { %3519 = shalt.err (!%p3516_p3)
}
  0xe9   :  { %89 = dma.hbm_to_vmem [thread:$0]  %s4232_s18, 4096, %s84_s15, [#allocation9], %s3698_s5, %s3698_s5, %s3699_s30  }
  0xea   :  { %s3709_s1 = smov [#allocation13]   ;;  %s3710_s26 = smov [#allocation16]  }
  0xeb   :  { %s110_s2 = sshll.u32 %s3709_s1, 4  ;;  %s132_s8 = sshll.u32 %s3710_s26, 4  ;;  %s111_s2 = int_to_ptr.vmem [resolvable:$true] %s110_s2  ;;  %s133_s8 = int_to_ptr.vmem [resolvable:$true] %s132_s8 }
  0xec   :  { %s4233_s4 = sld [smem:[#allocation47_spill]] }
  0xf2   :  { %s3520_s3 = scalar_lea.hbm %s4233_s4, 64 }
  0xf3   :  { %p3521_p4 = scmp.ne.s32.totalorder %s4233_s4, %s3520_s3  ;;  %p3524_p5 = scmp.lt.u32.totalorder %s3520_s3, %s4233_s4 }
  0xf5   :  { %p3526_p6 = pnand %p3524_p5, %p3521_p4 }
  0xf7   :  { %3529 = shalt.err (!%p3526_p6)
}
  0xf8   :  { %s3530_s5 = scalar_lea.vmem %s111_s2, 64  ;;  %p3535_p8 = scmp.lt.s32.totalorder %s111_s2, %s111_s2 }
  0xf9   :  { %p3531_p7 = scmp.ne.s32.totalorder %s111_s2, %s3530_s5  ;;  %p3536_p9 = scmp.lt.s32.totalorder %s3530_s5, %s3530_s5 }
  0xfb   :  { %p3537_p10 = por %p3536_p9, %p3535_p8 }
  0xfd   :  { %p3538_p11 = pnand %p3537_p10, %p3531_p7 }
  0xff   :  { %3541 = shalt.err (!%p3538_p11)
}
 0x100   :  { %113 = dma.hbm_to_vmem [thread:$0]  %s4233_s4, 64, %s111_s2, [#allocation12]  }
 0x101   :  { %s3542_s24 = scalar_lea.hbm %s4195_s9, 64 }
 0x102   :  { %p3543_p12 = scmp.ne.s32.totalorder %s4195_s9, %s3542_s24  ;;  %p3546_p13 = scmp.lt.u32.totalorder %s3542_s24, %s4195_s9 }
 0x104   :  { %p3548_p0 = pnand %p3546_p13, %p3543_p12 }
 0x106   :  { %3551 = shalt.err (!%p3548_p0)
}
 0x107   :  { %s3552_s26 = scalar_lea.vmem %s133_s8, 64  ;;  %p3557_p2 = scmp.lt.s32.totalorder %s133_s8, %s133_s8 }
 0x108   :  { %p3553_p1 = scmp.ne.s32.totalorder %s133_s8, %s3552_s26  ;;  %p3558_p3 = scmp.lt.s32.totalorder %s3552_s26, %s3552_s26 }
 0x10a   :  { %p3559_p4 = por %p3558_p3, %p3557_p2 }
 0x10c   :  { %p3560_p5 = pnand %p3559_p4, %p3553_p1 }
 0x10e   :  { %3563 = shalt.err (!%p3560_p5)
}
 0x10f   :  { %135 = dma.hbm_to_vmem [thread:$0]  %s4195_s9, 64, %s133_s8, [#allocation15]  }
 0x110   :  { %s3711_s27 = smov [#allocation19]   ;;  %s3712_s3 = smov [#allocation22]  }
 0x111   :  { %s152_s4 = sshll.u32 %s3711_s27, 4  ;;  %s176_s6 = sshll.u32 %s3712_s3, 4  ;;  %s153_s4 = int_to_ptr.vmem [resolvable:$true] %s152_s4  ;;  %s177_s6 = int_to_ptr.vmem [resolvable:$true] %s176_s6 }
 0x112   :  { %s3564_s0 = scalar_lea.hbm %s4197_s11, 64 }
 0x113   :  { %p3565_p6 = scmp.ne.s32.totalorder %s4197_s11, %s3564_s0  ;;  %p3568_p7 = scmp.lt.u32.totalorder %s3564_s0, %s4197_s11 }
 0x115   :  { %p3570_p8 = pnand %p3568_p7, %p3565_p6 }
 0x117   :  { %3573 = shalt.err (!%p3570_p8)
}
 0x118   :  { %s3574_s9 = scalar_lea.vmem %s153_s4, 64  ;;  %p3579_p10 = scmp.lt.s32.totalorder %s153_s4, %s153_s4 }
 0x119   :  { %p3575_p9 = scmp.ne.s32.totalorder %s153_s4, %s3574_s9  ;;  %p3580_p11 = scmp.lt.s32.totalorder %s3574_s9, %s3574_s9 }
 0x11b   :  { %p3581_p12 = por %p3580_p11, %p3579_p10 }
 0x11d   :  { %p3582_p13 = pnand %p3581_p12, %p3575_p9 }
 0x11f   :  { %3585 = shalt.err (!%p3582_p13)
}
 0x120   :  { %155 = dma.hbm_to_vmem [thread:$0]  %s4197_s11, 64, %s153_s4, [#allocation18]  }
 0x121   :  { %s3586_s29 = scalar_lea.hbm %s4200_s14, 64 }
 0x122   :  { %p3587_p0 = scmp.ne.s32.totalorder %s4200_s14, %s3586_s29  ;;  %p3590_p1 = scmp.lt.u32.totalorder %s3586_s29, %s4200_s14 }
 0x124   :  { %p3592_p2 = pnand %p3590_p1, %p3587_p0 }
 0x126   :  { %3595 = shalt.err (!%p3592_p2)
}
 0x127   :  { %s3596_s7 = scalar_lea.vmem %s177_s6, 64  ;;  %p3601_p4 = scmp.lt.s32.totalorder %s177_s6, %s177_s6 }
 0x128   :  { %p3597_p3 = scmp.ne.s32.totalorder %s177_s6, %s3596_s7  ;;  %p3602_p5 = scmp.lt.s32.totalorder %s3596_s7, %s3596_s7 }
 0x12a   :  { %p3603_p6 = por %p3602_p5, %p3601_p4 }
 0x12c   :  { %p3604_p7 = pnand %p3603_p6, %p3597_p3 }
 0x12e   :  { %3607 = shalt.err (!%p3604_p7)
}
 0x12f   :  { %179 = dma.hbm_to_vmem [thread:$0]  %s4200_s14, 64, %s177_s6, [#allocation21]  }
 0x130   :  { %s3713_s4 = smov [#allocation25]   ;;  %s3608_s0 = scalar_lea.hbm %s4203_s17, 2048 }
 0x131   :  { %s199_s3 = sshll.u32 %s3713_s4, 4  ;;  %p3609_p8 = scmp.ne.s32.totalorder %s4203_s17, %s3608_s0  ;;  %s200_s3 = int_to_ptr.vmem [resolvable:$true] %s199_s3 }
 0x132   :  { %p3612_p9 = scmp.lt.u32.totalorder %s3608_s0, %s4203_s17 }
 0x134   :  { %p3614_p10 = pnand %p3612_p9, %p3609_p8 }
 0x136   :  { %3617 = shalt.err (!%p3614_p10)
}
 0x137   :  { %s3618_s9 = scalar_lea.vmem %s200_s3, 2048  ;;  %p3623_p12 = scmp.lt.s32.totalorder %s200_s3, %s200_s3 }
 0x138   :  { %p3619_p11 = scmp.ne.s32.totalorder %s200_s3, %s3618_s9  ;;  %p3624_p13 = scmp.lt.s32.totalorder %s3618_s9, %s3618_s9 }
 0x13a   :  { %p3625_p0 = por %p3624_p13, %p3623_p12 }
 0x13c   :  { %p3626_p1 = pnand %p3625_p0, %p3619_p11 }
 0x13e   :  { %3629 = shalt.err (!%p3626_p1)
}
 0x13f   :  { %s3714_s14 = smov 64   ;;  %s3715_s6 = smov 4  }
 0x140   :  { %205 = dma.hbm_to_vmem [thread:$0]  %s4203_s17, 2048, %s200_s3, [#allocation24], %s3714_s14, %s3714_s14, %s3715_s6  }
 0x141   :  { %s3716_s24 = smov [#allocation28]   ;;  %s3630_s1 = scalar_lea.hbm %s4207_s21, 1024 }
 0x142   :  { %s225_s23 = sshll.u32 %s3716_s24, 4  ;;  %p3631_p2 = scmp.ne.s32.totalorder %s4207_s21, %s3630_s1  ;;  %s226_s23 = int_to_ptr.vmem [resolvable:$true] %s225_s23 }
 0x143   :  { %p3634_p3 = scmp.lt.u32.totalorder %s3630_s1, %s4207_s21 }
 0x145   :  { %p3636_p4 = pnand %p3634_p3, %p3631_p2 }
 0x147   :  { %3639 = shalt.err (!%p3636_p4)
}
 0x148   :  { %s3640_s27 = scalar_lea.vmem %s226_s23, 1024  ;;  %p3645_p6 = scmp.lt.s32.totalorder %s226_s23, %s226_s23 }
 0x149   :  { %p3641_p5 = scmp.ne.s32.totalorder %s226_s23, %s3640_s27  ;;  %p3646_p7 = scmp.lt.s32.totalorder %s3640_s27, %s3640_s27 }
 0x14b   :  { %p3647_p8 = por %p3646_p7, %p3645_p6 }
 0x14d   :  { %p3648_p9 = pnand %p3647_p8, %p3641_p5 }
 0x14f   :  { %3651 = shalt.err (!%p3648_p9)
}
 0x150   :  { %231 = dma.hbm_to_vmem [thread:$0]  %s4207_s21, 1024, %s226_s23, [#allocation27], %s3714_s14, %s3714_s14, %s3715_s6  }
 0x151   :  { %3674 = dma.done.wait [#allocation3], 128  }
 0x152   :  { %3675 = vsyncadd [#allocation3], 4294967168 }
 0x153   :  { %3676 = dma.done.wait [#allocation6], 256  }
 0x154   :  { %3677 = vsyncadd [#allocation6], 4294967040 }
 0x155   :  { %3678 = dma.done.wait [#allocation9], 4224  }
 0x156   :  { %3679 = vsyncadd [#allocation9], 4294963072 }
 0x157   :  { %3680 = dma.done.wait [#allocation12], 4160  }
 0x158   :  { %3681 = vsyncadd [#allocation12], 4294963136 }
 0x159   :  { %3682 = dma.done.wait [#allocation15], 4160  }
 0x15a   :  { %3683 = vsyncadd [#allocation15], 4294963136 }
 0x15b   :  { %3684 = dma.done.wait [#allocation18], 320  }
 0x15c   :  { %3685 = vsyncadd [#allocation18], 4294966976 }
 0x15d   :  { %3686 = dma.done.wait [#allocation21], 4160  }
 0x15e   :  { %3687 = vsyncadd [#allocation21], 4294963136 }
 0x15f   :  { %3688 = dma.done.wait [#allocation24], 10240  }
 0x160   :  { %3689 = vsyncadd [#allocation24], 4294957056 }
 0x161   :  { %3690 = dma.done.wait [#allocation27], 1040  }
 0x162   :  { %3691 = vsyncadd [#allocation27], 4294966256  ;;  %v3717_v0 = vmov 0   ;;  %v2934_v1 = vld [vmem:[#allocation10 + $0x4] ss:$16 sps:$4 sm:$0xff]   ;;  %vm1220_vm0 = vcmask 1043456  }
 0x163   :  { %581 = vmatprep.mubr.bf16.mxu1 %v3717_v0  ;;  %540 = vmatprep.mubr.bf16.mxu0 %v3717_v0  ;;  %v2936_v2 = vld [vmem:[#allocation10 + $0xc] ss:$16 sps:$4 sm:$0xff]   ;;  %v2938_v3 = vld [vmem:[#allocation10] ss:$16 sps:$4 sm:$0xff]   ;;  %v2939_v4 = vld [vmem:[#allocation10 + $0x8] ss:$16 sps:$4 sm:$0xff]  }
 0x164   :  { %508 = vmatprep.subr.bf16.mxu0 %v2934_v1  ;;  %549 = vmatprep.subr.bf16.mxu1 %v2936_v2  ;;  %v2940_v5 = vld [vmem:[#allocation10 + $0x24] ss:$16 sps:$4 sm:$0xff]   ;;  %v2942_v6 = vld [vmem:[#allocation10 + $0x2c] ss:$16 sps:$4 sm:$0xff]   ;;  %v2944_v7 = vld [vmem:[#allocation10 + $0x20] ss:$16 sps:$4 sm:$0xff]  }
 0x165   :  { %509 = vmatpush1.bf16.msra.mxu0 %v2938_v3  ;;  %550 = vmatpush1.bf16.msra.mxu1 %v2939_v4  ;;  %v2945_v8 = vld [vmem:[#allocation10 + $0x28] ss:$16 sps:$4 sm:$0xff]   ;;  %v2946_v9 = vld [vmem:[#allocation10 + $0x44] ss:$16 sps:$4 sm:$0xff]   ;;  %v2948_v10 = vld [vmem:[#allocation10 + $0x4c] ss:$16 sps:$4 sm:$0xff]  }
 0x166   :  { %510 = vmatprep.subr.bf16.mxu0 %v2940_v5  ;;  %551 = vmatprep.subr.bf16.mxu1 %v2942_v6  ;;  %v2950_v11 = vld [vmem:[#allocation10 + $0x40] ss:$16 sps:$4 sm:$0xff]   ;;  %v2951_v12 = vld [vmem:[#allocation10 + $0x48] ss:$16 sps:$4 sm:$0xff]   ;;  %v2952_v13 = vld [vmem:[#allocation10 + $0x64] ss:$16 sps:$4 sm:$0xff]  }
 0x167   :  { %v2954_v14 = vld [vmem:[#allocation10 + $0x6c] ss:$16 sps:$4 sm:$0xff]   ;;  %v2956_v15 = vld [vmem:[#allocation10 + $0x60] ss:$16 sps:$4 sm:$0xff]   ;;  %v2957_v16 = vld [vmem:[#allocation10 + $0x68] ss:$16 sps:$4 sm:$0xff]  }
 0x168   :  { %v2958_v17 = vld [vmem:[#allocation10 + $0x84] ss:$16 sps:$4 sm:$0xff]   ;;  %v2960_v18 = vld [vmem:[#allocation10 + $0x8c] ss:$16 sps:$4 sm:$0xff]   ;;  %v2962_v19 = vld [vmem:[#allocation10 + $0x80] ss:$16 sps:$4 sm:$0xff]  }
 0x169   :  { %511 = vmatpush1.bf16.msra.mxu0 %v2944_v7  ;;  %552 = vmatpush1.bf16.msra.mxu1 %v2945_v8  ;;  %v2963_v20 = vld [vmem:[#allocation10 + $0x88] ss:$16 sps:$4 sm:$0xff]   ;;  %v2964_v21 = vld [vmem:[#allocation10 + $0xa4] ss:$16 sps:$4 sm:$0xff]   ;;  %v2966_v22 = vld [vmem:[#allocation10 + $0xac] ss:$16 sps:$4 sm:$0xff]  }
 0x16a   :  { %512 = vmatprep.subr.bf16.mxu0 %v2946_v9  ;;  %553 = vmatprep.subr.bf16.mxu1 %v2948_v10  ;;  %v2968_v23 = vld [vmem:[#allocation10 + $0xa0] ss:$16 sps:$4 sm:$0xff]   ;;  %v2969_v24 = vld [vmem:[#allocation10 + $0xa8] ss:$16 sps:$4 sm:$0xff]   ;;  %v2970_v25 = vld [vmem:[#allocation10 + $0xc4] ss:$16 sps:$4 sm:$0xff]  }
 0x16b   :  { %v2972_v26 = vld [vmem:[#allocation10 + $0xcc] ss:$16 sps:$4 sm:$0xff]   ;;  %v2974_v27 = vld [vmem:[#allocation10 + $0xc0] ss:$16 sps:$4 sm:$0xff]   ;;  %v2975_v28 = vld [vmem:[#allocation10 + $0xc8] ss:$16 sps:$4 sm:$0xff]  }
 0x16c   :  { %v2976_v29 = vld [vmem:[#allocation10 + $0xe4] ss:$16 sps:$4 sm:$0xff]   ;;  %v2978_v30 = vld [vmem:[#allocation10 + $0xec] ss:$16 sps:$4 sm:$0xff]   ;;  %v2980_v31 = vld [vmem:[#allocation10 + $0xe0] ss:$16 sps:$4 sm:$0xff]  }
 0x16d   :  { %513 = vmatpush1.bf16.msra.mxu0 %v2950_v11  ;;  %554 = vmatpush1.bf16.msra.mxu1 %v2951_v12  ;;  %v2981_v32 = vld [vmem:[#allocation10 + $0xe8] ss:$16 sps:$4 sm:$0xff]   ;;  %v286_v33 = vld [vmem:[#allocation2] sm:$0xff]  ;;  %v2987_v35 = vld [vmem:[#allocation11 + $0xc] ss:$16 sps:$4 sm:$0xff]   ;;  %vm1216_vm1 = vcmask 64512  }
 0x16e   :  { %514 = vmatprep.subr.bf16.mxu0 %v2952_v13  ;;  %555 = vmatprep.subr.bf16.mxu1 %v2954_v14  ;;  %v2984_v34 = vld [vmem:[#allocation11 + $0x4] ss:$16 sps:$4 sm:$0xff]   ;;  %v287_v36 = vpack.c.bf16 %v286_v33, %v286_v33  ;;  %v2982_v37 = vld [vmem:[#allocation11] ss:$16 sps:$4 sm:$0xff]   ;;  %v2985_v38 = vld [vmem:[#allocation11 + $0x8] ss:$16 sps:$4 sm:$0xff]  }
 0x16f   :  { %v2990_v39 = vld [vmem:[#allocation11 + $0x24] ss:$16 sps:$4 sm:$0xff]   ;;  %v2993_v40 = vld [vmem:[#allocation11 + $0x2c] ss:$16 sps:$4 sm:$0xff]   ;;  %v2988_v41 = vld [vmem:[#allocation11 + $0x20] ss:$16 sps:$4 sm:$0xff]  }
 0x170   :  { %v2991_v42 = vld [vmem:[#allocation11 + $0x28] ss:$16 sps:$4 sm:$0xff]   ;;  %v2996_v43 = vld [vmem:[#allocation11 + $0x44] ss:$16 sps:$4 sm:$0xff]   ;;  %v2999_v44 = vld [vmem:[#allocation11 + $0x4c] ss:$16 sps:$4 sm:$0xff]  }
 0x171   :  { %515 = vmatpush1.bf16.msra.mxu0 %v2956_v15  ;;  %556 = vmatpush1.bf16.msra.mxu1 %v2957_v16  ;;  %v2994_v45 = vld [vmem:[#allocation11 + $0x40] ss:$16 sps:$4 sm:$0xff]   ;;  %v2997_v46 = vld [vmem:[#allocation11 + $0x48] ss:$16 sps:$4 sm:$0xff]   ;;  %v3002_v47 = vld [vmem:[#allocation11 + $0x64] ss:$16 sps:$4 sm:$0xff]  }
 0x172   :  { %516 = vmatprep.subr.bf16.mxu0 %v2958_v17  ;;  %557 = vmatprep.subr.bf16.mxu1 %v2960_v18  ;;  %v3005_v48 = vld [vmem:[#allocation11 + $0x6c] ss:$16 sps:$4 sm:$0xff]   ;;  %v3000_v49 = vld [vmem:[#allocation11 + $0x60] ss:$16 sps:$4 sm:$0xff]   ;;  %v3003_v50 = vld [vmem:[#allocation11 + $0x68] ss:$16 sps:$4 sm:$0xff]  }
 0x173   :  { %v3008_v51 = vld [vmem:[#allocation11 + $0x84] ss:$16 sps:$4 sm:$0xff]   ;;  %v3011_v52 = vld [vmem:[#allocation11 + $0x8c] ss:$16 sps:$4 sm:$0xff]   ;;  %v3006_v53 = vld [vmem:[#allocation11 + $0x80] ss:$16 sps:$4 sm:$0xff]  }
 0x174   :  { %v3009_v54 = vld [vmem:[#allocation11 + $0x88] ss:$16 sps:$4 sm:$0xff]   ;;  %v3014_v55 = vld [vmem:[#allocation11 + $0xa4] ss:$16 sps:$4 sm:$0xff]   ;;  %v3017_v56 = vld [vmem:[#allocation11 + $0xac] ss:$16 sps:$4 sm:$0xff]  }
 0x175   :  { %517 = vmatpush1.bf16.msra.mxu0 %v2962_v19  ;;  %558 = vmatpush1.bf16.msra.mxu1 %v2963_v20  ;;  %v3012_v57 = vld [vmem:[#allocation11 + $0xa0] ss:$16 sps:$4 sm:$0xff]   ;;  %v3015_v58 = vld [vmem:[#allocation11 + $0xa8] ss:$16 sps:$4 sm:$0xff]   ;;  %v3020_v59 = vld [vmem:[#allocation11 + $0xc4] ss:$16 sps:$4 sm:$0xff]  }
 0x176   :  { %518 = vmatprep.subr.bf16.mxu0 %v2964_v21  ;;  %559 = vmatprep.subr.bf16.mxu1 %v2966_v22  ;;  %v3023_v60 = vld [vmem:[#allocation11 + $0xcc] ss:$16 sps:$4 sm:$0xff]   ;;  %v3018_v61 = vld [vmem:[#allocation11 + $0xc0] ss:$16 sps:$4 sm:$0xff]   ;;  %v3021_v62 = vld [vmem:[#allocation11 + $0xc8] ss:$16 sps:$4 sm:$0xff]  }
 0x177   :  { %v3026_v63 = vld [vmem:[#allocation11 + $0xe4] ss:$16 sps:$4 sm:$0xff]   ;;  %v3029_v1 = vld [vmem:[#allocation11 + $0xec] ss:$16 sps:$4 sm:$0xff]   ;;  %v3024_v2 = vld [vmem:[#allocation11 + $0xe0] ss:$16 sps:$4 sm:$0xff]  }
 0x178   :  { %v3027_v3 = vld [vmem:[#allocation11 + $0xe8] ss:$16 sps:$4 sm:$0xff]   ;;  %v3035_v6 = vld [vmem:[#allocation14 + $0xc] ss:$16 sps:$4 sm:$0xff]   ;;  %v3030_v8 = vld [vmem:[#allocation14] ss:$16 sps:$4 sm:$0xff]  }
 0x179   :  { %519 = vmatpush1.bf16.msra.mxu0 %v2968_v23  ;;  %560 = vmatpush1.bf16.msra.mxu1 %v2969_v24  ;;  %v288_v4 = vld [vmem:[#allocation5] sm:$0xff]  ;;  %v3041_v11 = vld [vmem:[#allocation14 + $0x2c] ss:$16 sps:$4 sm:$0xff]   ;;  %v3036_v12 = vld [vmem:[#allocation14 + $0x20] ss:$16 sps:$4 sm:$0xff]   ;;  %s4234_s10 = sld [smem:[#allocation45_spill]] }
 0x17a   :  { %520 = vmatprep.subr.bf16.mxu0 %v2970_v25  ;;  %561 = vmatprep.subr.bf16.mxu1 %v2972_v26  ;;  %v3032_v5 = vld [vmem:[#allocation14 + $0x4] ss:$16 sps:$4 sm:$0xff]   ;;  %v289_v7 = vpack.c.bf16 %v288_v4, %v288_v4  ;;  %v3033_v9 = vld [vmem:[#allocation14 + $0x8] ss:$16 sps:$4 sm:$0xff]   ;;  %v3047_v15 = vld [vmem:[#allocation14 + $0x4c] ss:$16 sps:$4 sm:$0xff]  }
 0x17b   :  { %v3038_v10 = vld [vmem:[#allocation14 + $0x24] ss:$16 sps:$4 sm:$0xff]   ;;  %v3039_v13 = vld [vmem:[#allocation14 + $0x28] ss:$16 sps:$4 sm:$0xff]   ;;  %v3042_v16 = vld [vmem:[#allocation14 + $0x40] ss:$16 sps:$4 sm:$0xff]  }
 0x17c   :  { %v3044_v14 = vld [vmem:[#allocation14 + $0x44] ss:$16 sps:$4 sm:$0xff]   ;;  %v3045_v17 = vld [vmem:[#allocation14 + $0x48] ss:$16 sps:$4 sm:$0xff]   ;;  %v3053_v19 = vld [vmem:[#allocation14 + $0x6c] ss:$16 sps:$4 sm:$0xff]  }
 0x17d   :  { %521 = vmatpush1.bf16.msra.mxu0 %v2974_v27  ;;  %562 = vmatpush1.bf16.msra.mxu1 %v2975_v28  ;;  %v3050_v18 = vld [vmem:[#allocation14 + $0x64] ss:$16 sps:$4 sm:$0xff]   ;;  %v3048_v20 = vld [vmem:[#allocation14 + $0x60] ss:$16 sps:$4 sm:$0xff]   ;;  %v3051_v21 = vld [vmem:[#allocation14 + $0x68] ss:$16 sps:$4 sm:$0xff]  }
 0x17e   :  { %522 = vmatprep.subr.bf16.mxu0 %v2976_v29  ;;  %563 = vmatprep.subr.bf16.mxu1 %v2978_v30  ;;  %v3056_v22 = vld [vmem:[#allocation14 + $0x84] ss:$16 sps:$4 sm:$0xff]   ;;  %v3059_v23 = vld [vmem:[#allocation14 + $0x8c] ss:$16 sps:$4 sm:$0xff]   ;;  %v3054_v24 = vld [vmem:[#allocation14 + $0x80] ss:$16 sps:$4 sm:$0xff]  }
 0x17f   :  { %v3057_v25 = vld [vmem:[#allocation14 + $0x88] ss:$16 sps:$4 sm:$0xff]   ;;  %v3062_v26 = vld [vmem:[#allocation14 + $0xa4] ss:$16 sps:$4 sm:$0xff]   ;;  %v3065_v27 = vld [vmem:[#allocation14 + $0xac] ss:$16 sps:$4 sm:$0xff]  }
 0x180   :  { %v3060_v28 = vld [vmem:[#allocation14 + $0xa0] ss:$16 sps:$4 sm:$0xff]   ;;  %v3063_v29 = vld [vmem:[#allocation14 + $0xa8] ss:$16 sps:$4 sm:$0xff]   ;;  %v3068_v30 = vld [vmem:[#allocation14 + $0xc4] ss:$16 sps:$4 sm:$0xff]  }
 0x181   :  { %523 = vmatpush1.bf16.msra.mxu0 %v2980_v31  ;;  %564 = vmatpush1.bf16.msra.mxu1 %v2981_v32  ;;  %v3071_v31 = vld [vmem:[#allocation14 + $0xcc] ss:$16 sps:$4 sm:$0xff]   ;;  %v3066_v32 = vld [vmem:[#allocation14 + $0xc0] ss:$16 sps:$4 sm:$0xff]   ;;  %v3069_v33 = vld [vmem:[#allocation14 + $0xc8] ss:$16 sps:$4 sm:$0xff]  }
 0x182   :  { %804 = vmatprep.subr.bf16.mxu0 %v2984_v34  ;;  %845 = vmatprep.subr.bf16.mxu1 %v2987_v35  ;;  %v3074_v34 = vld [vmem:[#allocation14 + $0xe4] ss:$16 sps:$4 sm:$0xff]   ;;  %v3077_v35 = vld [vmem:[#allocation14 + $0xec] ss:$16 sps:$4 sm:$0xff]   ;;  %v3106_v4 = vld [vmem:[#allocation20 + $0x80] ss:$16 sps:$4 sm:$0xff]  }
 0x183   :  { %vm3719_vm2 = vmmov 0  }
 0x184   :  { %582 = vmatmul.mubr.bf16.vlgmr.msra.gmra.mrb[0].mxu1 %v287_v36  ;;  %541 = vmatmul.mubr.bf16.vlgmr.msra.gmra.mrb[0].mxu0 %v287_v36  ;;  %v1182_v36 = vld [vmem:[#allocation17] sm:$0xff] }
 0x185   :  { %805 = vmatpush1.bf16.msra.mxu0 %v2982_v37  ;;  %846 = vmatpush1.bf16.msra.mxu1 %v2985_v38  ;;  %v1183_v37 = vld [vmem:[#allocation17 + $0x8] sm:$0xff] }
 0x186   :  { %806 = vmatprep.subr.bf16.mxu0 %v2990_v39  ;;  %847 = vmatprep.subr.bf16.mxu1 %v2993_v40  ;;  %v3072_v38 = vld [vmem:[#allocation14 + $0xe0] ss:$16 sps:$4 sm:$0xff]   ;;  %v3075_v39 = vld [vmem:[#allocation14 + $0xe8] ss:$16 sps:$4 sm:$0xff]  }
 0x187   :  { %836 = vmatprep.mubr.bf16.mxu0 %v3717_v0  ;;  %877 = vmatprep.mubr.bf16.mxu1 %v3717_v0  ;;  %v290_v40 = vld [vmem:[#allocation7] sm:$0xff] }
 0x189   :  { %807 = vmatpush1.bf16.msra.mxu0 %v2988_v41  ;;  %848 = vmatpush1.bf16.msra.mxu1 %v2991_v42  ;;  %v2677_v41 = vcombine.high %v1182_v36, %v1182_v36  ;;  %v2676_v42 = vcombine.low %v1182_v36, %v1182_v36 }
 0x18a   :  { %808 = vmatprep.subr.bf16.mxu0 %v2996_v43  ;;  %849 = vmatprep.subr.bf16.mxu1 %v2999_v44  ;;  %v2678_v43 = vcombine.low %v1183_v37, %v1183_v37  ;;  %v291_v44 = vpack.c.bf16 %v290_v40, %v290_v40 }
 0x18d   :  { %809 = vmatpush1.bf16.msra.mxu0 %v2994_v45  ;;  %850 = vmatpush1.bf16.msra.mxu1 %v2997_v46  ;;  %v1222_v45 = vsel %vm1220_vm0, %v2676_v42, 0  ;;  %v2679_v46 = vcombine.high %v1183_v37, %v1183_v37 }
 0x18e   :  { %810 = vmatprep.subr.bf16.mxu0 %v3002_v47  ;;  %851 = vmatprep.subr.bf16.mxu1 %v3005_v48  ;;  %v292_v47 = vld [vmem:[#allocation8] sm:$0xff]  ;;  %v1228_v48 = vsel %vm1220_vm0, %v2678_v43, 0 }
 0x191   :  { %811 = vmatpush1.bf16.msra.mxu0 %v3000_v49  ;;  %852 = vmatpush1.bf16.msra.mxu1 %v3003_v50  ;;  %v293_v49 = vpack.c.bf16 %v292_v47, %v292_v47  ;;  %v3082_v50 = vld [vmem:[#allocation20] ss:$16 sps:$4 sm:$0xff]  }
 0x192   :  { %812 = vmatprep.subr.bf16.mxu0 %v3008_v51  ;;  %853 = vmatprep.subr.bf16.mxu1 %v3011_v52  ;;  %v3084_v51 = vld [vmem:[#allocation20 + $0x4] ss:$16 sps:$4 sm:$0xff]   ;;  %v3085_v52 = vld [vmem:[#allocation20 + $0x8] ss:$16 sps:$4 sm:$0xff]  }
 0x195   :  { %813 = vmatpush1.bf16.msra.mxu0 %v3006_v53  ;;  %854 = vmatpush1.bf16.msra.mxu1 %v3009_v54  ;;  %v3087_v53 = vld [vmem:[#allocation20 + $0xc] ss:$16 sps:$4 sm:$0xff]   ;;  %v3090_v54 = vld [vmem:[#allocation20 + $0x24] ss:$16 sps:$4 sm:$0xff]  }
 0x196   :  { %814 = vmatprep.subr.bf16.mxu0 %v3014_v55  ;;  %855 = vmatprep.subr.bf16.mxu1 %v3017_v56  ;;  %v3093_v55 = vld [vmem:[#allocation20 + $0x2c] ss:$16 sps:$4 sm:$0xff]   ;;  %v3088_v56 = vld [vmem:[#allocation20 + $0x20] ss:$16 sps:$4 sm:$0xff]  }
 0x199   :  { %815 = vmatpush1.bf16.msra.mxu0 %v3012_v57  ;;  %856 = vmatpush1.bf16.msra.mxu1 %v3015_v58  ;;  %v3091_v57 = vld [vmem:[#allocation20 + $0x28] ss:$16 sps:$4 sm:$0xff]   ;;  %v3096_v58 = vld [vmem:[#allocation20 + $0x44] ss:$16 sps:$4 sm:$0xff]  }
 0x19a   :  { %816 = vmatprep.subr.bf16.mxu0 %v3020_v59  ;;  %857 = vmatprep.subr.bf16.mxu1 %v3023_v60  ;;  %v3099_v59 = vld [vmem:[#allocation20 + $0x4c] ss:$16 sps:$4 sm:$0xff]   ;;  %v3094_v60 = vld [vmem:[#allocation20 + $0x40] ss:$16 sps:$4 sm:$0xff]  }
 0x19d   :  { %817 = vmatpush1.bf16.msra.mxu0 %v3018_v61  ;;  %858 = vmatpush1.bf16.msra.mxu1 %v3021_v62  ;;  %v3102_v61 = vld [vmem:[#allocation20 + $0x64] ss:$16 sps:$4 sm:$0xff]   ;;  %v3105_v62 = vld [vmem:[#allocation20 + $0x6c] ss:$16 sps:$4 sm:$0xff]  }
 0x19e   :  { %818 = vmatprep.subr.bf16.mxu0 %v3026_v63  ;;  %859 = vmatprep.subr.bf16.mxu1 %v3029_v1  ;;  %v3100_v63 = vld [vmem:[#allocation20 + $0x60] ss:$16 sps:$4 sm:$0xff]   ;;  %v3103_v1 = vld [vmem:[#allocation20 + $0x68] ss:$16 sps:$4 sm:$0xff]  }
 0x1a1   :  { %819 = vmatpush1.bf16.msra.mxu0 %v3024_v2  ;;  %860 = vmatpush1.bf16.msra.mxu1 %v3027_v3  ;;  %v3108_v2 = vld [vmem:[#allocation20 + $0x84] ss:$16 sps:$4 sm:$0xff]   ;;  %v3111_v3 = vld [vmem:[#allocation20 + $0x8c] ss:$16 sps:$4 sm:$0xff]  }
 0x1a2   :  { %1100 = vmatprep.subr.bf16.mxu0 %v3032_v5  ;;  %1141 = vmatprep.subr.bf16.mxu1 %v3035_v6  ;;  %v3109_v5 = vld [vmem:[#allocation20 + $0x88] ss:$16 sps:$4 sm:$0xff]   ;;  %v3114_v6 = vld [vmem:[#allocation20 + $0xa4] ss:$16 sps:$4 sm:$0xff]  }
 0x1a4   :  { %837 = vmatmul.mubr.bf16.vlgmr.msra.gmra.mrb[4].mxu0 %v289_v7  ;;  %878 = vmatmul.mubr.bf16.vlgmr.msra.gmra.mrb[4].mxu1 %v289_v7  ;;  %v3117_v7 = vld [vmem:[#allocation20 + $0xac] ss:$16 sps:$4 sm:$0xff]  }
 0x1a5   :  { %1101 = vmatpush1.bf16.msra.mxu0 %v3030_v8  ;;  %1142 = vmatpush1.bf16.msra.mxu1 %v3033_v9  ;;  %v3112_v8 = vld [vmem:[#allocation20 + $0xa0] ss:$16 sps:$4 sm:$0xff]   ;;  %v3115_v9 = vld [vmem:[#allocation20 + $0xa8] ss:$16 sps:$4 sm:$0xff]  }
 0x1a6   :  { %1102 = vmatprep.subr.bf16.mxu0 %v3038_v10  ;;  %1143 = vmatprep.subr.bf16.mxu1 %v3041_v11  ;;  %v3120_v10 = vld [vmem:[#allocation20 + $0xc4] ss:$16 sps:$4 sm:$0xff]   ;;  %v3123_v11 = vld [vmem:[#allocation20 + $0xcc] ss:$16 sps:$4 sm:$0xff]  }
 0x1a7   :  { %1132 = vmatprep.mubr.bf16.mxu0 %v3717_v0  ;;  %1173 = vmatprep.mubr.bf16.mxu1 %v3717_v0 }
 0x1a9   :  { %1103 = vmatpush1.bf16.msra.mxu0 %v3036_v12  ;;  %1144 = vmatpush1.bf16.msra.mxu1 %v3039_v13  ;;  %v3118_v12 = vld [vmem:[#allocation20 + $0xc0] ss:$16 sps:$4 sm:$0xff]   ;;  %v3121_v13 = vld [vmem:[#allocation20 + $0xc8] ss:$16 sps:$4 sm:$0xff]  }
 0x1aa   :  { %1104 = vmatprep.subr.bf16.mxu0 %v3044_v14  ;;  %1145 = vmatprep.subr.bf16.mxu1 %v3047_v15  ;;  %v3126_v14 = vld [vmem:[#allocation20 + $0xe4] ss:$16 sps:$4 sm:$0xff]   ;;  %v3129_v15 = vld [vmem:[#allocation20 + $0xec] ss:$16 sps:$4 sm:$0xff]  }
 0x1ad   :  { %1105 = vmatpush1.bf16.msra.mxu0 %v3042_v16  ;;  %1146 = vmatpush1.bf16.msra.mxu1 %v3045_v17  ;;  %v3124_v16 = vld [vmem:[#allocation20 + $0xe0] ss:$16 sps:$4 sm:$0xff]   ;;  %v3127_v17 = vld [vmem:[#allocation20 + $0xe8] ss:$16 sps:$4 sm:$0xff]  }
 0x1ae   :  { %1106 = vmatprep.subr.bf16.mxu0 %v3050_v18  ;;  %1147 = vmatprep.subr.bf16.mxu1 %v3053_v19  ;;  %v3132_v18 = vld [vmem:[#allocation23 + $0x4] ss:$8 sps:$4 sm:$0xff]  }
 0x1b1   :  { %1107 = vmatpush1.bf16.msra.mxu0 %v3048_v20  ;;  %1148 = vmatpush1.bf16.msra.mxu1 %v3051_v21 }
 0x1b2   :  { %1108 = vmatprep.subr.bf16.mxu0 %v3056_v22  ;;  %1149 = vmatprep.subr.bf16.mxu1 %v3059_v23 }
 0x1b5   :  { %1109 = vmatpush1.bf16.msra.mxu0 %v3054_v24  ;;  %1150 = vmatpush1.bf16.msra.mxu1 %v3057_v25 }
 0x1b6   :  { %1110 = vmatprep.subr.bf16.mxu0 %v3062_v26  ;;  %1151 = vmatprep.subr.bf16.mxu1 %v3065_v27  ;;  %v328_v27 = vlaneseq }
 0x1b9   :  { %1111 = vmatpush1.bf16.msra.mxu0 %v3060_v28  ;;  %1152 = vmatpush1.bf16.msra.mxu1 %v3063_v29  ;;  %v329_v28 = vshrl.u32 %v328_v27, 7 }
 0x1ba   :  { %1112 = vmatprep.subr.bf16.mxu0 %v3068_v30  ;;  %1153 = vmatprep.subr.bf16.mxu1 %v3071_v31  ;;  %v326_v31 = vld [vmem:[%s4234_s10] sm:$0xf] }
 0x1bb   :  { %v4081_v29 = vsub.s32 2, %v329_v28  ;;  %v4083_v30 = vsub.s32 0, %v329_v28 }
 0x1bd   :  { %1113 = vmatpush1.bf16.msra.mxu0 %v3066_v32  ;;  %1154 = vmatpush1.bf16.msra.mxu1 %v3069_v33  ;;  %v4088_v32 = vsub.s32 3, %v329_v28  ;;  %v4090_v33 = vsub.s32 1, %v329_v28  ;;  %v331_v36 = vrot.slane %v326_v31, %v4083_v30 }
 0x1be   :  { %1114 = vmatprep.subr.bf16.mxu0 %v3074_v34  ;;  %1155 = vmatprep.subr.bf16.mxu1 %v3077_v35  ;;  %v622_v34 = vld [vmem:[#allocation13] sm:$0xf]  ;;  %v339_v35 = vrot.slane %v326_v31, %v4081_v29 }
 0x1bf   :  { %v627_v37 = vrot.slane %v622_v34, %v4083_v30  ;;  %v335_v40 = vrot.slane %v326_v31, %v4090_v33  ;;  %v639_v42 = vrot.slane %v622_v34, %v4088_v32 }
 0x1c1   :  { %1115 = vmatpush1.bf16.msra.mxu0 %v3072_v38  ;;  %1156 = vmatpush1.bf16.msra.mxu1 %v3075_v39  ;;  %v635_v38 = vrot.slane %v622_v34, %v4081_v29  ;;  %v343_v39 = vrot.slane %v326_v31, %v4088_v32 }
 0x1c2   :  { %2680 = vmatprep.subr.msk.bf16.mxu1 %vm1220_vm0, %v2677_v41  ;;  %1553 = vmatprep.subr.bf16.mxu0 %v3084_v51  ;;  %v631_v41 = vrot.slane %v622_v34, %v4090_v33 }
 0x1c4   :  { %1133 = vmatmul.mubr.bf16.vlgmr.msra.gmra.mrb[8].mxu0 %v291_v44  ;;  %1174 = vmatmul.mubr.bf16.vlgmr.msra.gmra.mrb[8].mxu1 %v291_v44 }
 0x1c5   :  { %1234 = vmatpush1.bf16.msra.mxu1 %v1222_v45  ;;  %1265 = vmatprep.mubr.bf16.mxu1 %v3717_v0 }
 0x1c6   :  { %2682 = vmatprep.subr.msk.bf16.mxu1 %vm1220_vm0, %v2679_v46  ;;  %1585 = vmatprep.mubr.bf16.mxu0 %v3717_v0 }
 0x1c7   :  { %1554 = vmatpush1.bf16.msra.mxu0 %v3082_v50 }
 0x1c8   :  { %1555 = vmatprep.subr.bf16.mxu0 %v3090_v54 }
 0x1cb   :  { %1556 = vmatpush1.bf16.msra.mxu0 %v3088_v56 }
 0x1cc   :  { %2681 = vmatmul.mubr.msk.bf16.vlgmr.msra.gmra.mrb[12].mxu1 %vm1216_vm1, %v293_v49  ;;  %1557 = vmatprep.subr.bf16.mxu0 %v3096_v58 }
 0x1cd   :  { %1275 = vmatpush1.bf16.msra.mxu1 %v1228_v48  ;;  %1306 = vmatprep.mubr.bf16.mxu1 %v3717_v0 }
 0x1ce   :  { %1594 = vmatprep.subr.bf16.mxu1 %v3087_v53 }
 0x1cf   :  { %1558 = vmatpush1.bf16.msra.mxu0 %v3094_v60 }
 0x1d0   :  { %1559 = vmatprep.subr.bf16.mxu0 %v3102_v61 }
 0x1d3   :  { %1560 = vmatpush1.bf16.msra.mxu0 %v3100_v63 }
 0x1d4   :  { %2683 = vmatmul.mubr.msk.bf16.vlgmr.msra.gmra.mrb[16].mxu1 %vm1216_vm1, %v293_v49  ;;  %1561 = vmatprep.subr.bf16.mxu0 %v3108_v2 }
 0x1d5   :  { %1626 = vmatprep.mubr.bf16.mxu1 %v3717_v0  ;;  %1595 = vmatpush1.bf16.msra.mxu1 %v3085_v52  ;;  %v3097_v0 = vld [vmem:[#allocation20 + $0x48] ss:$16 sps:$4 sm:$0xff]  }
 0x1d6   :  { %1596 = vmatprep.subr.bf16.mxu1 %v3093_v55 }
 0x1d7   :  { %1562 = vmatpush1.bf16.msra.mxu0 %v3106_v4 }
 0x1d8   :  { %1563 = vmatprep.subr.bf16.mxu0 %v3114_v6 }
 0x1d9   :  { %1597 = vmatpush1.bf16.msra.mxu1 %v3091_v57 }
 0x1da   :  { %1598 = vmatprep.subr.bf16.mxu1 %v3099_v59 }
 0x1db   :  { %1564 = vmatpush1.bf16.msra.mxu0 %v3112_v8 }
 0x1dc   :  { %1565 = vmatprep.subr.bf16.mxu0 %v3120_v10 }
 0x1dd   :  { %1599 = vmatpush1.bf16.msra.mxu1 %v3097_v0 }
 0x1de   :  { %1600 = vmatprep.subr.bf16.mxu1 %v3105_v62  ;;  %v918_v62 = vld [vmem:[#allocation16] sm:$0xf] }
 0x1df   :  { %1566 = vmatpush1.bf16.msra.mxu0 %v3118_v12  ;;  %v923_v63 = vrot.slane %v918_v62, %v4083_v30  ;;  %v927_v2 = vrot.slane %v918_v62, %v4090_v33 }
 0x1e0   :  { %1567 = vmatprep.subr.bf16.mxu0 %v3126_v14 }
 0x1e1   :  { %1601 = vmatpush1.bf16.msra.mxu1 %v3103_v1  ;;  %v931_v1 = vrot.slane %v918_v62, %v4081_v29 }
 0x1e2   :  { %1602 = vmatprep.subr.bf16.mxu1 %v3111_v3  ;;  %v935_v3 = vrot.slane %v918_v62, %v4088_v32  ;;  %v3148_v62 = vld [vmem:[#allocation23 + $0x60] ss:$8 sps:$4 sm:$0xff]  }
 0x1e3   :  { %1568 = vmatpush1.bf16.msra.mxu0 %v3124_v16 }
 0x1e4   :  { %2063 = vmatprep.subr.bf16.mxu0 %v3132_v18 }
 0x1e5   :  { %1603 = vmatpush1.bf16.msra.mxu1 %v3109_v5 }
 0x1e6   :  { %1604 = vmatprep.subr.bf16.mxu1 %v3117_v7 }
 0x1e9   :  { %1605 = vmatpush1.bf16.msra.mxu1 %v3115_v9 }
 0x1ea   :  { %1606 = vmatprep.subr.bf16.mxu1 %v3123_v11 }
 0x1ed   :  { %1607 = vmatpush1.bf16.msra.mxu1 %v3121_v13  ;;  %v1184_v13 = vld [vmem:[#allocation19] sm:$0xf] }
 0x1ee   :  { %1608 = vmatprep.subr.bf16.mxu1 %v3129_v15 }
 0x1f1   :  { %1609 = vmatpush1.bf16.msra.mxu1 %v3127_v17 }
 0x257   :  { %v583_v19 = vpop.f32.mrb[0].mxu1  ;;  %v542_v20 = vpop.f32.mrb[0].mxu0 }
 0x258   :  { %v585_v21 = vpop.f32.mrb[1].mxu1  ;;  %v544_v22 = vpop.f32.mrb[1].mxu0  ;;  %v584_v45 = vadd.f32 %v583_v19, %v339_v35  ;;  %v543_v46 = vadd.f32 %v542_v20, %v331_v36  ;;  %v1197_v35 = vrot.slane %v1184_v13, %v4081_v29 }
 0x259   :  { %v587_v23 = vpop.f32.mrb[2].mxu1  ;;  %v546_v24 = vpop.f32.mrb[2].mxu0  ;;  %v586_v51 = vadd.f32 %v585_v21, %v343_v39  ;;  %v545_v52 = vadd.f32 %v544_v22, %v335_v40  ;;  %v1189_v21 = vrot.slane %v1184_v13, %v4083_v30  ;;  %v1193_v22 = vrot.slane %v1184_v13, %v4090_v33 }
 0x25a   :  { %v588_v25 = vpop.f32.mrb[3].mxu1  ;;  %v547_v26 = vpop.f32.mrb[3].mxu0 }
 0x277   :  { %v838_v43 = vpop.f32.mrb[4].mxu0  ;;  %v879_v44 = vpop.f32.mrb[4].mxu1 }
 0x278   :  { %v839_v47 = vadd.f32 %v838_v43, %v627_v37  ;;  %v880_v48 = vadd.f32 %v879_v44, %v635_v38  ;;  %v840_v49 = vpop.f32.mrb[5].mxu0  ;;  %v881_v50 = vpop.f32.mrb[5].mxu1  ;;  %v1201_v37 = vrot.slane %v1184_v13, %v4088_v32  ;;  %v3169_v13 = vld [vmem:[#allocation23 + $0xd0] ss:$8 sps:$4 sm:$0xff]  }
 0x279   :  { %v841_v53 = vadd.f32 %v840_v49, %v631_v41  ;;  %v882_v54 = vadd.f32 %v881_v50, %v639_v42  ;;  %v883_v55 = vpop.f32.mrb[6].mxu1  ;;  %v842_v56 = vpop.f32.mrb[6].mxu0  ;;  %v3130_v50 = vld [vmem:[#allocation23] ss:$8 sps:$4 sm:$0xff]  }
 0x27a   :  { %v1315_v57 = vmul.f32 %v839_v47, %v543_v46  ;;  %v1317_v58 = vmul.f32 %v880_v48, %v584_v45  ;;  %v884_v59 = vpop.f32.mrb[7].mxu1  ;;  %v843_v60 = vpop.f32.mrb[7].mxu0  ;;  %v2684_v47 = vld [vmem:[%s4198_s12] ss:$0 sm:$0xff]  ;;  %v3141_v56 = vld [vmem:[#allocation23 + $0x34] ss:$8 sps:$4 sm:$0xff]  }
 0x27b   :  { %v1316_v0 = vmul.f32 %v841_v53, %v545_v52  ;;  %v1318_v61 = vmul.f32 %v882_v54, %v586_v51  ;;  %v3135_v52 = vld [vmem:[#allocation23 + $0x14] ss:$8 sps:$4 sm:$0xff]   ;;  %v3133_v53 = vld [vmem:[#allocation23 + $0x10] ss:$8 sps:$4 sm:$0xff]   ;;  %v3138_v54 = vld [vmem:[#allocation23 + $0x24] ss:$8 sps:$4 sm:$0xff]  }
 0x27c   :  { %v3136_v55 = vld [vmem:[#allocation23 + $0x20] ss:$8 sps:$4 sm:$0xff]   ;;  %v3147_v60 = vld [vmem:[#allocation23 + $0x54] ss:$8 sps:$4 sm:$0xff]  }
 0x27d   :  { %v3142_v59 = vld [vmem:[#allocation23 + $0x40] ss:$8 sps:$4 sm:$0xff]  }
 0x297   :  { %v1134_v4 = vpop.f32.mrb[8].mxu0  ;;  %v1175_v5 = vpop.f32.mrb[8].mxu1 }
 0x298   :  { %v1135_v6 = vadd.f32 %v1134_v4, %v923_v63  ;;  %v1176_v7 = vadd.f32 %v1175_v5, %v931_v1  ;;  %v1136_v8 = vpop.f32.mrb[9].mxu0  ;;  %v1177_v9 = vpop.f32.mrb[9].mxu1  ;;  %v3153_v63 = vld [vmem:[#allocation23 + $0x74] ss:$8 sps:$4 sm:$0xff]   ;;  %v3151_v1 = vld [vmem:[#allocation23 + $0x70] ss:$8 sps:$4 sm:$0xff]  }
 0x299   :  { %v1137_v10 = vadd.f32 %v1136_v8, %v927_v2  ;;  %v1178_v11 = vadd.f32 %v1177_v9, %v935_v3  ;;  %v1179_v12 = vpop.f32.mrb[10].mxu1  ;;  %v1138_v14 = vpop.f32.mrb[10].mxu0  ;;  %v3156_v2 = vld [vmem:[#allocation23 + $0x84] ss:$8 sps:$4 sm:$0xff]   ;;  %v3154_v3 = vld [vmem:[#allocation23 + $0x80] ss:$8 sps:$4 sm:$0xff]  }
 0x29a   :  { %v1319_v15 = vmul.f32 %v1315_v57, %v1135_v6  ;;  %v1321_v16 = vmul.f32 %v1317_v58, %v1176_v7  ;;  %v1180_v17 = vpop.f32.mrb[11].mxu1  ;;  %v1139_v18 = vpop.f32.mrb[11].mxu0  ;;  %v3139_v57 = vld [vmem:[#allocation23 + $0x30] ss:$8 sps:$4 sm:$0xff]   ;;  %v3144_v58 = vld [vmem:[#allocation23 + $0x44] ss:$8 sps:$4 sm:$0xff]  }
 0x29b   :  { %v1320_v19 = vmul.f32 %v1316_v0, %v1137_v10  ;;  %v1322_v20 = vmul.f32 %v1318_v61, %v1178_v11  ;;  %v3145_v0 = vld [vmem:[#allocation23 + $0x50] ss:$8 sps:$4 sm:$0xff]   ;;  %v3150_v61 = vld [vmem:[#allocation23 + $0x64] ss:$8 sps:$4 sm:$0xff]   ;;  %v3159_v4 = vld [vmem:[#allocation23 + $0x94] ss:$8 sps:$4 sm:$0xff]  }
 0x29c   :  { %v3157_v5 = vld [vmem:[#allocation23 + $0x90] ss:$8 sps:$4 sm:$0xff]   ;;  %v3162_v6 = vld [vmem:[#allocation23 + $0xa4] ss:$8 sps:$4 sm:$0xff]   ;;  %v3160_v7 = vld [vmem:[#allocation23 + $0xa0] ss:$8 sps:$4 sm:$0xff]  }
 0x29d   :  { %v3165_v8 = vld [vmem:[#allocation23 + $0xb4] ss:$8 sps:$4 sm:$0xff]   ;;  %v3163_v9 = vld [vmem:[#allocation23 + $0xb0] ss:$8 sps:$4 sm:$0xff]   ;;  %v3168_v10 = vld [vmem:[#allocation23 + $0xc4] ss:$8 sps:$4 sm:$0xff]  }
 0x29e   :  { %v3166_v11 = vld [vmem:[#allocation23 + $0xc0] ss:$8 sps:$4 sm:$0xff]   ;;  %v3171_v12 = vld [vmem:[#allocation23 + $0xd4] ss:$8 sps:$4 sm:$0xff]   ;;  %v3174_v14 = vld [vmem:[#allocation23 + $0xe4] ss:$8 sps:$4 sm:$0xff]  }
 0x29f   :  { %v1267_v23 = vpop.f32.mrb[12].mxu1  ;;  %v3175_v17 = vld [vmem:[#allocation23 + $0xf0] ss:$8 sps:$4 sm:$0xff]   ;;  %v3180_v18 = vld [vmem:[#allocation23 + $0x104] ss:$8 sps:$4 sm:$0xff]  }
 0x2a0   :  { %v1268_v24 = vadd.f32 %v1267_v23, %v1189_v21  ;;  %v1269_v25 = vpop.f32.mrb[13].mxu1  ;;  %v3228_v21 = vld [vmem:[#allocation25 + $0x48] sm:$0xff]   ;;  %v3230_v23 = vld [vmem:[#allocation25 + $0x50] sm:$0xff]  }
 0x2a1   :  { %v1270_v26 = vadd.f32 %v1269_v25, %v1193_v22  ;;  %v1271_v27 = vpop.f32.mrb[14].mxu1  ;;  %v3229_v22 = vld [vmem:[#allocation25 + $0x8] sm:$0xff]   ;;  %v3232_v25 = vld [vmem:[#allocation25 + $0x58] sm:$0xff]  }
 0x2a2   :  { %v1323_v28 = vmul.f32 %v1319_v15, %v1268_v24  ;;  %v1272_v31 = vpop.f32.mrb[15].mxu1  ;;  %v3172_v15 = vld [vmem:[#allocation23 + $0xe0] ss:$8 sps:$4 sm:$0xff]   ;;  %v3231_v24 = vld [vmem:[#allocation25 + $0x10] sm:$0xff]  }
 0x2a3   :  { %v1324_v34 = vmul.f32 %v1320_v19, %v1270_v26  ;;  %v3226_v19 = vld [vmem:[#allocation25 + $0x40] sm:$0xff]   ;;  %v3233_v26 = vld [vmem:[#allocation25 + $0x18] sm:$0xff]   ;;  %v3236_v31 = vld [vmem:[#allocation25 + $0x68] sm:$0xff]  }
 0x2a4   :  { %2821 = vmatprep.subr.bf16.mxu1 %v3226_v19  ;;  %v3234_v27 = vld [vmem:[#allocation25 + $0x60] sm:$0xff]  }
 0x2a5   :  { %v1327_v36 = vadd.f32 %v1324_v34, %v1323_v28  ;;  %v3235_v28 = vld [vmem:[#allocation25 + $0x20] sm:$0xff]   ;;  %v3237_v34 = vld [vmem:[#allocation25 + $0x28] sm:$0xff]  }
 0x2a7   :  { %v1308_v38 = vpop.f32.mrb[16].mxu1 }
 0x2a8   :  { %v1309_v39 = vadd.f32 %v1308_v38, %v1197_v35  ;;  %v1310_v40 = vpop.f32.mrb[17].mxu1  ;;  %v4111_v35 = vld [vmem:[#allocation22] sm:$0xf] }
 0x2a9   :  { %v1311_v41 = vadd.f32 %v1310_v40, %v1201_v37  ;;  %v1312_v42 = vpop.f32.mrb[18].mxu1  ;;  %v1380_v37 = vrot.slane %v4111_v35, %v4090_v33  ;;  %v1388_v38 = vrot.slane %v4111_v35, %v4088_v32 }
 0x2aa   :  { %v1325_v43 = vmul.f32 %v1321_v16, %v1309_v39  ;;  %v1313_v44 = vpop.f32.mrb[19].mxu1  ;;  %v3177_v16 = vld [vmem:[#allocation23 + $0xf4] ss:$8 sps:$4 sm:$0xff]  }
 0x2ab   :  { %v1326_v45 = vmul.f32 %v1322_v20, %v1311_v41  ;;  %v3227_v20 = vld [vmem:[#allocation25] sm:$0xff]  }
 0x2ac   :  { %v1328_v46 = vadd.f32 %v1327_v36, %v1325_v43  ;;  %v1376_v36 = vrot.slane %v4111_v35, %v4083_v30 }
 0x2ae   :  { %v1329_v48 = vadd.f32 %v1328_v46, %v1326_v45 }
 0x2b0   :  { %v1337_v49 = vadd.f32 %v2684_v47, %v1329_v48 }
 0x2b2   :  { %v1338_v51 = vpack.c.bf16 %v1337_v49, %v1337_v49 }
 0x2b4   :  { %1586 = vmatmul.mubr.bf16.vlgmr.msra.gmra.mrb[12].mxu0 %v1338_v51  ;;  %1627 = vmatmul.mubr.bf16.vlgmr.msra.gmra.mrb[20].mxu1 %v1338_v51 }
 0x2b5   :  { %2064 = vmatpush1.bf16.msra.mxu0 %v3130_v50  ;;  %2822 = vmatpush3.bf16.msra.mxu1 %v3227_v20  ;;  %v3199_v20 = vld [vmem:[#allocation23 + $0x170] ss:$8 sps:$4 sm:$0xff]  }
 0x2b6   :  { %2065 = vmatprep.subr.bf16.mxu0 %v3135_v52  ;;  %2823 = vmatprep.subr.bf16.mxu1 %v3228_v21  ;;  %v3204_v21 = vld [vmem:[#allocation23 + $0x184] ss:$8 sps:$4 sm:$0xff]  }
 0x2b9   :  { %2066 = vmatpush1.bf16.msra.mxu0 %v3133_v53  ;;  %2824 = vmatpush3.bf16.msra.mxu1 %v3229_v22 }
 0x2ba   :  { %2067 = vmatprep.subr.bf16.mxu0 %v3138_v54  ;;  %2825 = vmatprep.subr.bf16.mxu1 %v3230_v23  ;;  %v3202_v23 = vld [vmem:[#allocation23 + $0x180] ss:$8 sps:$4 sm:$0xff]  }
 0x2bd   :  { %2068 = vmatpush1.bf16.msra.mxu0 %v3136_v55  ;;  %2826 = vmatpush3.bf16.msra.mxu1 %v3231_v24  ;;  %v3207_v24 = vld [vmem:[#allocation23 + $0x194] ss:$8 sps:$4 sm:$0xff]  }
 0x2be   :  { %2069 = vmatprep.subr.bf16.mxu0 %v3141_v56  ;;  %2827 = vmatprep.subr.bf16.mxu1 %v3232_v25  ;;  %v3210_v25 = vld [vmem:[#allocation23 + $0x1a4] ss:$8 sps:$4 sm:$0xff]  }
 0x2c1   :  { %2070 = vmatpush1.bf16.msra.mxu0 %v3139_v57  ;;  %2828 = vmatpush3.bf16.msra.mxu1 %v3233_v26  ;;  %v3208_v26 = vld [vmem:[#allocation23 + $0x1a0] ss:$8 sps:$4 sm:$0xff]  }
 0x2c2   :  { %2071 = vmatprep.subr.bf16.mxu0 %v3144_v58  ;;  %2829 = vmatprep.subr.bf16.mxu1 %v3234_v27  ;;  %v3213_v27 = vld [vmem:[#allocation23 + $0x1b4] ss:$8 sps:$4 sm:$0xff]  }
 0x2c5   :  { %2072 = vmatpush1.bf16.msra.mxu0 %v3142_v59  ;;  %2830 = vmatpush3.bf16.msra.mxu1 %v3235_v28  ;;  %v3211_v28 = vld [vmem:[#allocation23 + $0x1b0] ss:$8 sps:$4 sm:$0xff]  }
 0x2c6   :  { %2073 = vmatprep.subr.bf16.mxu0 %v3147_v60  ;;  %2831 = vmatprep.subr.bf16.mxu1 %v3236_v31 }
 0x2c9   :  { %2074 = vmatpush1.bf16.msra.mxu0 %v3145_v0  ;;  %2832 = vmatpush3.bf16.msra.mxu1 %v3237_v34  ;;  %v3216_v34 = vld [vmem:[#allocation23 + $0x1c4] ss:$8 sps:$4 sm:$0xff]  }
 0x2ca   :  { %2075 = vmatprep.subr.bf16.mxu0 %v3150_v61 }
 0x2cd   :  { %2076 = vmatpush1.bf16.msra.mxu0 %v3148_v62 }
 0x2ce   :  { %2077 = vmatprep.subr.bf16.mxu0 %v3153_v63 }
 0x2d1   :  { %2078 = vmatpush1.bf16.msra.mxu0 %v3151_v1  ;;  %v3178_v1 = vld [vmem:[#allocation23 + $0x100] ss:$8 sps:$4 sm:$0xff]  }
 0x2d2   :  { %2079 = vmatprep.subr.bf16.mxu0 %v3156_v2 }
 0x2d5   :  { %2080 = vmatpush1.bf16.msra.mxu0 %v3154_v3  ;;  %v3183_v3 = vld [vmem:[#allocation23 + $0x114] ss:$8 sps:$4 sm:$0xff]  }
 0x2d6   :  { %2081 = vmatprep.subr.bf16.mxu0 %v3159_v4 }
 0x2d9   :  { %2082 = vmatpush1.bf16.msra.mxu0 %v3157_v5  ;;  %v3181_v5 = vld [vmem:[#allocation23 + $0x110] ss:$8 sps:$4 sm:$0xff]  }
 0x2da   :  { %2083 = vmatprep.subr.bf16.mxu0 %v3162_v6  ;;  %v3186_v6 = vld [vmem:[#allocation23 + $0x124] ss:$8 sps:$4 sm:$0xff]  }
 0x2dd   :  { %2084 = vmatpush1.bf16.msra.mxu0 %v3160_v7  ;;  %v3184_v7 = vld [vmem:[#allocation23 + $0x120] ss:$8 sps:$4 sm:$0xff]  }
 0x2de   :  { %2085 = vmatprep.subr.bf16.mxu0 %v3165_v8  ;;  %v3189_v8 = vld [vmem:[#allocation23 + $0x134] ss:$8 sps:$4 sm:$0xff]  }
 0x2e1   :  { %2086 = vmatpush1.bf16.msra.mxu0 %v3163_v9  ;;  %v3187_v9 = vld [vmem:[#allocation23 + $0x130] ss:$8 sps:$4 sm:$0xff]  }
 0x2e2   :  { %2087 = vmatprep.subr.bf16.mxu0 %v3168_v10  ;;  %v3192_v10 = vld [vmem:[#allocation23 + $0x144] ss:$8 sps:$4 sm:$0xff]  }
 0x2e5   :  { %2088 = vmatpush1.bf16.msra.mxu0 %v3166_v11  ;;  %v3190_v11 = vld [vmem:[#allocation23 + $0x140] ss:$8 sps:$4 sm:$0xff]  }
 0x2e6   :  { %2089 = vmatprep.subr.bf16.mxu0 %v3171_v12  ;;  %v3195_v12 = vld [vmem:[#allocation23 + $0x154] ss:$8 sps:$4 sm:$0xff]  }
 0x2e9   :  { %2090 = vmatpush1.bf16.msra.mxu0 %v3169_v13  ;;  %v1384_v13 = vrot.slane %v4111_v35, %v4081_v29  ;;  %v3205_v29 = vld [vmem:[#allocation23 + $0x190] ss:$8 sps:$4 sm:$0xff]  }
 0x2ea   :  { %2091 = vmatprep.subr.bf16.mxu0 %v3174_v14  ;;  %v3193_v14 = vld [vmem:[#allocation23 + $0x150] ss:$8 sps:$4 sm:$0xff]  }
 0x2ed   :  { %2092 = vmatpush1.bf16.msra.mxu0 %v3172_v15  ;;  %v3198_v15 = vld [vmem:[#allocation23 + $0x164] ss:$8 sps:$4 sm:$0xff]  }
 0x2ee   :  { %2093 = vmatprep.subr.bf16.mxu0 %v3177_v16 }
 0x2f1   :  { %2094 = vmatpush1.bf16.msra.mxu0 %v3175_v17  ;;  %v3196_v17 = vld [vmem:[#allocation23 + $0x160] ss:$8 sps:$4 sm:$0xff]  }
 0x2f2   :  { %2104 = vmatprep.subr.bf16.mxu0 %v3180_v18  ;;  %v3201_v18 = vld [vmem:[#allocation23 + $0x174] ss:$8 sps:$4 sm:$0xff]  }
 0x387   :  { %v1587_v39 = vpop.f32.mrb[12].mxu0  ;;  %v1628_v40 = vpop.f32.mrb[20].mxu1 }
 0x388   :  { %v1588_v41 = vadd.f32 %v1587_v39, %v1376_v36  ;;  %v1589_v42 = vpop.f32.mrb[13].mxu0  ;;  %v1630_v43 = vpop.f32.mrb[21].mxu1  ;;  %v1629_v16 = vadd.f32 %v1628_v40, %v1384_v13  ;;  %v3214_v36 = vld [vmem:[#allocation23 + $0x1c0] ss:$8 sps:$4 sm:$0xff]   ;;  %v3222_v39 = vld [vmem:[#allocation23 + $0x1e4] ss:$8 sps:$4 sm:$0xff]  }
 0x389   :  { %v1590_v44 = vadd.f32 %v1589_v42, %v1380_v37  ;;  %v1631_v45 = vadd.f32 %v1630_v43, %v1388_v38  ;;  %v1591_v46 = vpop.f32.mrb[14].mxu0  ;;  %v1632_v47 = vpop.f32.mrb[22].mxu1  ;;  %v3219_v37 = vld [vmem:[#allocation23 + $0x1d4] ss:$8 sps:$4 sm:$0xff]   ;;  %v3217_v38 = vld [vmem:[#allocation23 + $0x1d0] ss:$8 sps:$4 sm:$0xff]  }
 0x38a   :  { %v1635_v48 = vmax.f32 %v1588_v41, 0.0  ;;  %v1592_v49 = vpop.f32.mrb[15].mxu0  ;;  %v1633_v50 = vpop.f32.mrb[23].mxu1  ;;  %v1637_v19 = vmax.f32 %v1629_v16, 0.0  ;;  %v3220_v40 = vld [vmem:[#allocation23 + $0x1e0] ss:$8 sps:$4 sm:$0xff]  }
 0x38b   :  { %v1636_v51 = vmax.f32 %v1590_v44, 0.0  ;;  %v1638_v52 = vmax.f32 %v1631_v45, 0.0  ;;  %v3225_v41 = vld [vmem:[#allocation23 + $0x1f4] ss:$8 sps:$4 sm:$0xff]   ;;  %v3223_v42 = vld [vmem:[#allocation23 + $0x1f0] ss:$8 sps:$4 sm:$0xff]  }
 0x38c   :  { %v2717_v53 = vmul.f32 -1.442695, %v1635_v48  ;;  %v2719_v22 = vmul.f32 -1.442695, %v1637_v19  ;;  %v3238_v45 = vld [vmem:[#allocation25 + $0x70] sm:$0xff]   ;;  %v3240_v47 = vld [vmem:[#allocation25 + $0x78] sm:$0xff]  }
 0x38d   :  { %v2718_v54 = vmul.f32 -1.442695, %v1636_v51  ;;  %v2720_v55 = vmul.f32 -1.442695, %v1638_v52  ;;  %v3239_v46 = vld [vmem:[#allocation25 + $0x30] sm:$0xff]   ;;  %2833 = vmatprep.subr.bf16.mxu1 %v3238_v45  ;;  %v3241_v48 = vld [vmem:[#allocation25 + $0x38] sm:$0xff]  }
 0x38e   :  { %3258 = vpow2.f32 %v2717_v53  ;;  %2834 = vmatpush3.bf16.msra.mxu1 %v3239_v46  ;;  %v3718_v49 = vmov 0.0   ;;  %v1731_v50 = vld [vmem:[%s4202_s16] sm:$0x3]  ;;  %v3256_v19 = vld [vmem:[#allocation28 + $0x30] sm:$0xff]  }
 0x38f   :  { %3260 = vpow2.f32 %v2718_v54  ;;  %2835 = vmatprep.subr.bf16.mxu1 %v3240_v47  ;;  %v1736_v51 = vrot.slane %v1731_v50, %v4083_v30  ;;  %v1740_v52 = vrot.slane %v1731_v50, %v4090_v33  ;;  %v3243_v30 = vld [vmem:[%s4205_s19 + $0x8] sm:$0xff]   ;;  %v3244_v33 = vld [vmem:[%s4205_s19 + $0x10] sm:$0xff]   ;;  %v3253_v16 = vld [vmem:[#allocation28 + $0x18] sm:$0xff]  }
 0x390   :  { %3262 = vpow2.f32 %v2720_v55 }
 0x392   :  { %2836 = vmatpush3.bf16.msra.mxu1 %v3241_v48 }
 0x393   :  { %2861 = vmatprep.subr.bf16.mxu1 %v3718_v49 }
 0x398   :  { %v3259_v32 = vpop.eup %3258 }
 0x399   :  { %v1651_v56 = vadd.f32 1.0, %v3259_v32  ;;  %v3261_v57 = vpop.eup %3260 }
 0x39a   :  { %v3263_v58 = vpop.eup %3262  ;;  %v1652_v59 = vadd.f32 1.0, %v3261_v57 }
 0x39b   :  { %3264 = vrcp.f32 %v1651_v56  ;;  %v1654_v60 = vadd.f32 1.0, %v3263_v58 }
 0x39c   :  { %3266 = vrcp.f32 %v1652_v59 }
 0x39d   :  { %3268 = vrcp.f32 %v1654_v60 }
 0x39e   :  { %3270 = vpow2.f32 %v2719_v22 }
 0x3a5   :  { %v3265_v0 = vpop.eup %3264 }
 0x3a6   :  { %v3267_v61 = vpop.eup %3266  ;;  %v1663_v2 = vpack.c.bf16 %v3265_v0, %v3265_v0  ;;  %v3242_v0 = vld [vmem:[%s4205_s19] sm:$0xff]  }
 0x3a7   :  { %v3269_v62 = vpop.eup %3268  ;;  %v1664_v63 = vpack.c.bf16 %v3267_v61, %v3267_v61 }
 0x3a8   :  { %v1666_v4 = vpack.c.bf16 %v3269_v62, %v3269_v62  ;;  %v3271_v31 = vpop.eup %3270  ;;  %v3245_v62 = vld [vmem:[%s4205_s19 + $0x18] sm:$0xff]  }
 0x3a9   :  { %2095 = vmatprep.mubr.bf16.mxu0 %v1664_v63  ;;  %v1653_v35 = vadd.f32 1.0, %v3271_v31  ;;  %v3246_v63 = vld [vmem:[%s4205_s19 + $0x20] sm:$0xff]  }
 0x3aa   :  { %2096 = vmatmul.mubr.bf16.vlgmr.msra.gmra.mrb[16].mxu0 %v1663_v2  ;;  %v3248_v2 = vld [vmem:[%s4205_s19 + $0x30] sm:$0xff]  }
 0x3ab   :  { %2105 = vmatpush1.bf16.msra.mxu0 %v3178_v1  ;;  %2136 = vmatprep.mubr.bf16.mxu0 %v1666_v4  ;;  %3272 = vrcp.f32 %v1653_v35  ;;  %v3247_v1 = vld [vmem:[%s4205_s19 + $0x28] sm:$0xff]  }
 0x3ac   :  { %2106 = vmatprep.subr.bf16.mxu0 %v3183_v3  ;;  %v3249_v3 = vld [vmem:[%s4205_s19 + $0x38] sm:$0xff]  }
 0x3af   :  { %2107 = vmatpush1.bf16.msra.mxu0 %v3181_v5  ;;  %v2785_v5 = vld [vmem:[#allocation26] ss:$0 sm:$0xff] }
 0x3b0   :  { %2108 = vmatprep.subr.bf16.mxu0 %v3186_v6 }
 0x3b3   :  { %2109 = vmatpush1.bf16.msra.mxu0 %v3184_v7 }
 0x3b4   :  { %2110 = vmatprep.subr.bf16.mxu0 %v3189_v8 }
 0x3b5   :  { %v3273_v43 = vpop.eup %3272 }
 0x3b6   :  { %v1665_v44 = vpack.c.bf16 %v3273_v43, %v3273_v43 }
 0x3b7   :  { %2111 = vmatpush1.bf16.msra.mxu0 %v3187_v9 }
 0x3b8   :  { %2112 = vmatprep.subr.bf16.mxu0 %v3192_v10 }
 0x3bb   :  { %2113 = vmatpush1.bf16.msra.mxu0 %v3190_v11 }
 0x3bc   :  { %2114 = vmatprep.subr.bf16.mxu0 %v3195_v12  ;;  %v3250_v12 = vld [vmem:[#allocation28] sm:$0xff]  }
 0x3bf   :  { %2115 = vmatpush1.bf16.msra.mxu0 %v3193_v14  ;;  %v3251_v14 = vld [vmem:[#allocation28 + $0x8] sm:$0xff]  }
 0x3c0   :  { %2116 = vmatprep.subr.bf16.mxu0 %v3198_v15  ;;  %v3252_v15 = vld [vmem:[#allocation28 + $0x10] sm:$0xff]  }
 0x3c3   :  { %2117 = vmatpush1.bf16.msra.mxu0 %v3196_v17  ;;  %v3254_v17 = vld [vmem:[#allocation28 + $0x20] sm:$0xff]  }
 0x3c4   :  { %2118 = vmatprep.subr.bf16.mxu0 %v3201_v18  ;;  %v3255_v18 = vld [vmem:[#allocation28 + $0x28] sm:$0xff]  }
 0x3c7   :  { %2119 = vmatpush1.bf16.msra.mxu0 %v3199_v20  ;;  %v3257_v20 = vld [vmem:[#allocation28 + $0x38] sm:$0xff]  }
 0x3c8   :  { %2120 = vmatprep.subr.bf16.mxu0 %v3204_v21  ;;  %v2802_v21 = vld [vmem:[%s4206_s20] ss:$0 sm:$0xff]  ;;  %s3720_s20 = smov [#allocation29]  }
 0x3c9   :  { %s2563_s17 = sshll.u32 %s3720_s20, 4  ;;  %s2564_s17 = int_to_ptr.vmem [resolvable:$true] %s2563_s17 }
 0x3ca   :  { %s3652_s4 = scalar_lea.vmem %s2564_s17, 128  ;;  %p3657_p11 = scmp.lt.s32.totalorder %s2564_s17, %s2564_s17 }
 0x3cb   :  { %2121 = vmatpush1.bf16.msra.mxu0 %v3202_v23  ;;  %p3653_p10 = scmp.ne.s32.totalorder %s2564_s17, %s3652_s4  ;;  %p3658_p12 = scmp.lt.s32.totalorder %s3652_s4, %s3652_s4 }
 0x3cc   :  { %2122 = vmatprep.subr.bf16.mxu0 %v3207_v24 }
 0x3cd   :  { %p3659_p13 = por %p3658_p12, %p3657_p11 }
 0x3cf   :  { %2123 = vmatpush1.bf16.msra.mxu0 %v3205_v29  ;;  %p3660_p0 = pnand %p3659_p13, %p3653_p10 }
 0x3d0   :  { %2124 = vmatprep.subr.bf16.mxu0 %v3210_v25 }
 0x3d3   :  { %2125 = vmatpush1.bf16.msra.mxu0 %v3208_v26 }
 0x3d4   :  { %2126 = vmatprep.subr.bf16.mxu0 %v3213_v27 }
 0x3d7   :  { %2127 = vmatpush1.bf16.msra.mxu0 %v3211_v28  ;;  %v2811_v28 = vld [vmem:[%s4208_s22] ss:$0 sm:$0xff] }
 0x3d8   :  { %2128 = vmatprep.subr.bf16.mxu0 %v3216_v34 }
 0x3db   :  { %2129 = vmatpush1.bf16.msra.mxu0 %v3214_v36 }
 0x3dc   :  { %2130 = vmatprep.subr.bf16.mxu0 %v3219_v37 }
 0x3df   :  { %2131 = vmatpush1.bf16.msra.mxu0 %v3217_v38 }
 0x3e0   :  { %2132 = vmatprep.subr.bf16.mxu0 %v3222_v39 }
 0x3e3   :  { %2133 = vmatpush1.bf16.msra.mxu0 %v3220_v40 }
 0x3e4   :  { %2134 = vmatprep.subr.bf16.mxu0 %v3225_v41 }
 0x3e7   :  { %2135 = vmatpush1.bf16.msra.mxu0 %v3223_v42 }
 0x3ea   :  { %2137 = vmatmul.mubr.bf16.vlgmr.msra.gmra.mrb[16].mxu0 %v1665_v44 }
 0x4bd   :  { %v2138_v53 = vpop.f32.mrb[16].mxu0 }
 0x4be   :  { %v2901_v54 = vadd.f32 %v2138_v53, %v1736_v51  ;;  %v2140_v55 = vpop.f32.mrb[17].mxu0 }
 0x4bf   :  { %v2902_v32 = vadd.f32 %v2140_v55, %v1740_v52  ;;  %v2142_v56 = vpop.f32.mrb[18].mxu0 }
 0x4c0   :  { %v2145_v57 = vmax.f32 %v2901_v54, 0.0  ;;  %v2143_v58 = vpop.f32.mrb[19].mxu0 }
 0x4c1   :  { %v2146_v59 = vmax.f32 %v2902_v32, 0.0 }
 0x4c2   :  { %v2147_v61 = vpack.c.bf16 %v2145_v57, %v2145_v57 }
 0x4c3   :  { %v2148_v60 = vpack.c.bf16 %v2146_v59, %v2146_v59 }
 0x4c5   :  { %2316 = vmatprep.mubr.bf16.mxu1 %v2148_v60 }
 0x4c6   :  { %2317 = vmatmul.mubr.bf16.vlgmr.msra.gmra.mrb[24].mxu1 %v2147_v61 }
 0x4c7   :  { %2862 = vmatpush3.bf16.msra.mxu1 %v3242_v0  ;;  %2877 = vmatprep.mubr.msk.bf16.mxu1 %vm3719_vm2, %v3718_v49 }
 0x4c8   :  { %2863 = vmatprep.subr.bf16.mxu1 %v3718_v49 }
 0x4cb   :  { %2864 = vmatpush3.bf16.msra.mxu1 %v3243_v30 }
 0x4cc   :  { %2865 = vmatprep.subr.bf16.mxu1 %v3718_v49 }
 0x4cf   :  { %2866 = vmatpush3.bf16.msra.mxu1 %v3244_v33 }
 0x4d0   :  { %2867 = vmatprep.subr.bf16.mxu1 %v3718_v49 }
 0x4d3   :  { %2868 = vmatpush3.bf16.msra.mxu1 %v3245_v62 }
 0x4d4   :  { %2869 = vmatprep.subr.bf16.mxu1 %v3718_v49 }
 0x4d7   :  { %2870 = vmatpush3.bf16.msra.mxu1 %v3246_v63 }
 0x4d8   :  { %2871 = vmatprep.subr.bf16.mxu1 %v3718_v49 }
 0x4db   :  { %2872 = vmatpush3.bf16.msra.mxu1 %v3247_v1 }
 0x4dc   :  { %2873 = vmatprep.subr.bf16.mxu1 %v3718_v49 }
 0x4df   :  { %2874 = vmatpush3.bf16.msra.mxu1 %v3248_v2 }
 0x4e0   :  { %2875 = vmatprep.subr.bf16.mxu1 %v3718_v49 }
 0x4e3   :  { %2876 = vmatpush3.bf16.msra.mxu1 %v3249_v3 }
 0x4e4   :  { %2881 = vmatprep.subr.bf16.mxu1 %v3718_v49 }
 0x599   :  { %v2837_v4 = vpop.f32.mrb[24].mxu1 }
 0x59a   :  { %v2838_v6 = vpop.f32.mrb[25].mxu1 }
 0x59b   :  { %v2839_v7 = vadd.f32 %v2838_v6, %v2837_v4  ;;  %v2840_v8 = vpop.f32.mrb[26].mxu1 }
 0x59c   :  { %v2841_v9 = vpop.f32.mrb[27].mxu1 }
 0x59d   :  { %v2319_v10 = vadd.f32 %v2839_v7, %v2785_v5 }
 0x59f   :  { %v2324_v11 = vmax.f32 %v2319_v10, 0.0 }
 0x5a1   :  { %v2325_v13 = vpack.c.bf16 %v2324_v11, %v2324_v11 }
 0x5a3   :  { %2878 = vmatmul.mubr.bf16.vlgmr.msra.gmra.mrb[28].mxu1 %v2325_v13 }
 0x5a4   :  { %2882 = vmatpush3.bf16.msra.mxu1 %v3250_v12  ;;  %2897 = vmatprep.mubr.msk.bf16.mxu1 %vm3719_vm2, %v3718_v49 }
 0x5a5   :  { %2883 = vmatprep.subr.bf16.mxu1 %v3718_v49 }
 0x5a8   :  { %2884 = vmatpush3.bf16.msra.mxu1 %v3251_v14 }
 0x5a9   :  { %2885 = vmatprep.subr.bf16.mxu1 %v3718_v49 }
 0x5ac   :  { %2886 = vmatpush3.bf16.msra.mxu1 %v3252_v15 }
 0x5ad   :  { %2887 = vmatprep.subr.bf16.mxu1 %v3718_v49 }
 0x5b0   :  { %2888 = vmatpush3.bf16.msra.mxu1 %v3253_v16 }
 0x5b1   :  { %2889 = vmatprep.subr.bf16.mxu1 %v3718_v49 }
 0x5b4   :  { %2890 = vmatpush3.bf16.msra.mxu1 %v3254_v17 }
 0x5b5   :  { %2891 = vmatprep.subr.bf16.mxu1 %v3718_v49 }
 0x5b8   :  { %2892 = vmatpush3.bf16.msra.mxu1 %v3255_v18 }
 0x5b9   :  { %2893 = vmatprep.subr.bf16.mxu1 %v3718_v49 }
 0x5bc   :  { %2894 = vmatpush3.bf16.msra.mxu1 %v3256_v19 }
 0x5bd   :  { %2895 = vmatprep.subr.bf16.mxu1 %v3718_v49 }
 0x5c0   :  { %2896 = vmatpush3.bf16.msra.mxu1 %v3257_v20 }
 0x676   :  { %v2431_v22 = vpop.f32.mrb[28].mxu1 }
 0x677   :  { %v2432_v23 = vadd.f32 %v2802_v21, %v2431_v22  ;;  %v2879_v24 = vpop.f32.mrb[29].mxu1 }
 0x678   :  { %v2434_v29 = vpop.f32.mrb[30].mxu1 }
 0x679   :  { %v2437_v25 = vmax.f32 %v2432_v23, 0.0  ;;  %v2880_v26 = vpop.f32.mrb[31].mxu1 }
 0x67b   :  { %v2438_v27 = vpack.c.bf16 %v2437_v25, %v2437_v25 }
 0x67d   :  { %2898 = vmatmul.mubr.bf16.vlgmr.msra.gmra.mrb[32].mxu1 %v2438_v27 }
 0x750   :  { %v2544_v31 = vpop.f32.mrb[32].mxu1 }
 0x751   :  { %v2545_v34 = vadd.f32 %v2811_v28, %v2544_v31  ;;  %v2899_v35 = vpop.f32.mrb[33].mxu1 }
 0x752   :  { %v2547_v36 = vpop.f32.mrb[34].mxu1 }
 0x753   :  { %v2820_v37 = vmul.f32 -1.442695, %v2545_v34  ;;  %v2900_v38 = vpop.f32.mrb[35].mxu1 }
 0x755   :  { %3274 = vpow2.f32 %v2820_v37 }
 0x75f   :  { %v3275_v39 = vpop.eup %3274 }
 0x760   :  { %v2553_v40 = vadd.f32 1.0, %v3275_v39 }
 0x762   :  { %3276 = vrcp.f32 %v2553_v40 }
 0x76c   :  { %v3277_v41 = vpop.eup %3276 }
 0x76d   :  { %2556 = vst [vmem:[#allocation29] sm:$0xff] %v3277_v41 }
 0x76e   :  { %3663 = shalt.err (!%p3660_p0)
}
 0x76f   :  { %s4235_s3 = sld [smem:[#allocation48_spill]] }
 0x775   :  { %s3664_s10 = scalar_lea.hbm %s4235_s3, 128 }
 0x776   :  { %p3665_p1 = scmp.ne.s32.totalorder %s4235_s3, %s3664_s10  ;;  %p3668_p2 = scmp.lt.u32.totalorder %s3664_s10, %s4235_s3 }
 0x778   :  { %p3670_p3 = pnand %p3668_p2, %p3665_p1 }
 0x77a   :  { %3673 = shalt.err (!%p3670_p3)
}
 0x77b   :  { %2566 = dma.vmem_to_hbm [thread:$0]  %s2564_s17, 128, %s4235_s3, [#allocation4]  }
 0x77c   :  { %3692 = dma.done.wait [#allocation4], 128  }
 0x77d   :  { %3693 = vsyncadd [#allocation4], 4294967168 }
 0x77e   :  { %2570 = vsyncpa [#allocation3], 1 }
 0x77f   :  { %2571 = vsyncpa [#allocation6], 1 }
 0x780   :  { %2572 = vsyncpa [#allocation9], 1 }
 0x781   :  { %2573 = vsyncpa [#allocation12], 1 }
 0x782   :  { %2574 = vsyncpa [#allocation15], 1 }
 0x783   :  { %2575 = vsyncpa [#allocation18], 1 }
 0x784   :  { %2576 = vsyncpa [#allocation21], 1 }
 0x785   :  { %2577 = vsyncpa [#allocation24], 1 }
 0x786   :  { %2578 = vsyncpa [#allocation27], 1 }
 0x787   :  { %2579 = vsyncpa [#allocation4], 1 }

</bundles_post_ra>
